<compile_context>
chip_gen: v7x
topology: tpu7x:2x2x1
jax: 0.10.0
libtpu: 0.0.40
codegen_flags: <defaults>
</compile_context>

<pallas_src>
import functools

import jax
import jax.numpy as jnp
from jax.experimental import pallas as pl
from jax.experimental.pallas import tpu as pltpu

NDF = 16       # feature channels (ndf in the PyTorch module)
KS = 5         # conv kernel size
PAD = 2        # reflection padding
EPS = 1e-5     # BatchNorm eps
N_LAYERS = 10  # number of (pad, conv, bn, act) blocks in m0


def _restore_net_kernel(x_ref, w_ref, gb_ref, rt_ref, o_ref, xp_ref, *, N, H, W):
    """One grid step == one (ReflectionPad, Conv5x5, BatchNorm, ReLU/Sigmoid) block.

    x_ref : (N*H, W*C)          layer-0 input, lane-dense (channels fastest)
    w_ref : (1, KS, W*C, W*C)   this layer's per-ky reflect-Toeplitz conv matrices
    gb_ref: (1, 2, C)           BN gamma (row 0) / beta (row 1)
    rt_ref: (C, W*C)            replication matrix: rt[c, x*C + cc] = (cc == c)
    o_ref : (N*H, W*C)          network output (written on the last step only)
    xp_ref: (N, H+2*PAD, W*C)   persistent row-padded activation scratch (VMEM)
    """
    WC = W * NDF
    l = pl.program_id(0)
    inv_nhw = 1.0 / (N * H * W)

    # -- step 0: drop the network input into the scratch interior -------------
    @pl.when(l == 0)
    def _():
        xp_ref[:, PAD:PAD + H, :] = x_ref[...].reshape(N, H, WC)

    # -- ReflectionPad2d(2), rows only (column reflection is folded into w) ---
    # padded row 0 <- orig row 2, row 1 <- orig 1, row H+2 <- orig H-2, row H+3 <- orig H-3
    xp_ref[:, 0:1, :] = xp_ref[:, PAD + 2:PAD + 3, :]
    xp_ref[:, 1:2, :] = xp_ref[:, PAD + 1:PAD + 2, :]
    xp_ref[:, PAD + H:PAD + H + 1, :] = xp_ref[:, PAD + H - 2:PAD + H - 1, :]
    xp_ref[:, PAD + H + 1:PAD + H + 2, :] = xp_ref[:, PAD + H - 3:PAD + H - 2, :]

    # -- conv5x5 as 5 lane-dense matmuls (one per ky), accumulated in f32 -----
    acc = jnp.zeros((N * H, WC), jnp.float32)
    for ky in range(KS):
        lhs = xp_ref[:, ky:ky + H, :].reshape(N * H, WC)          # (N*H, W*C)
        acc = acc + jnp.dot(lhs, w_ref[0, ky],
                            preferred_element_type=jnp.float32)   # (N*H, W*C)
    # conv bias omitted: exactly cancelled by the training-mode BN mean subtraction.

    # -- BatchNorm2d (batch stats, biased variance), fused to one scale+shift -
    rt = rt_ref[...]                                              # (C, W*C)
    s1 = jnp.sum(acc, axis=0, keepdims=True)                      # (1, W*C)
    s2 = jnp.sum(acc * acc, axis=0, keepdims=True)                # (1, W*C)
    stats = jnp.concatenate([s1, s2], axis=0)                     # (2, W*C)
    # per-channel reduce over the x positions folded into the lane axis (MXU, no relayout)
    stats_c = jax.lax.dot_general(stats, rt, (((1,), (1,)), ((), ())),
                                  preferred_element_type=jnp.float32)  # (2, C)
    mean = stats_c[0:1] * inv_nhw                                 # (1, C)
    var = jnp.maximum(stats_c[1:2] * inv_nhw - mean * mean, 0.0)  # biased variance
    gamma = gb_ref[0, 0:1, :]                                     # (1, C)
    beta = gb_ref[0, 1:2, :]                                      # (1, C)
    scale_c = gamma * jax.lax.rsqrt(var + EPS)
    shift_c = beta - mean * scale_c
    ss = jnp.concatenate([scale_c, shift_c], axis=0)              # (2, C)
    ss_row = jnp.dot(ss, rt, preferred_element_type=jnp.float32)  # (2, W*C) broadcast
    y = acc * ss_row[0:1] + ss_row[1:2]                           # (N*H, W*C)

    # -- activation + hand-off to the next layer / output ---------------------
    @pl.when(l < N_LAYERS - 1)
    def _():
        xp_ref[:, PAD:PAD + H, :] = jnp.maximum(y, 0.0).reshape(N, H, WC)

    @pl.when(l == N_LAYERS - 1)
    def _():
        o_ref[...] = jax.nn.sigmoid(y)                            # lane-dense store


# ------------------------------ parameter packing ----------------------------

def _reflect(q, size):
    """Original index read by reflect-padded (pad=2) index q in [0, size+3]."""
    r = q - PAD
    if r < 0:
        r = -r
    if r >= size:
        r = 2 * (size - 1) - r
    return r


def _col_reflect_mats(W):
    """S[kx, xin, xout] = 1 iff padded column (xout + kx) reads original column xin."""
    mats = [[[0.0] * W for _ in range(W)] for _ in range(KS)]
    for kx in range(KS):
        for xout in range(W):
            mats[kx][_reflect(xout + kx, W)][xout] = 1.0
    return jnp.array(mats, jnp.float32)                            # (KS, W, W)


def init_params(key):
    """Deterministic parameters matching the PyTorch module's shapes."""
    params = []
    cin = 1
    for _ in range(N_LAYERS):
        key, k_w, k_b, k_g, k_be = jax.random.split(key, 5)
        fan_in = cin * KS * KS
        bound = 1.0 / float(fan_in) ** 0.5
        w = jax.random.uniform(k_w, (NDF, cin, KS, KS), jnp.float32, -bound, bound)
        b = jax.random.uniform(k_b, (NDF,), jnp.float32, -bound, bound)
        gamma = 1.0 + 0.1 * jax.random.normal(k_g, (NDF,), jnp.float32)
        beta = 0.1 * jax.random.normal(k_be, (NDF,), jnp.float32)
        params.append((w, b, gamma, beta))
        cin = NDF
    return params


def pack_params(params, W):
    """One-time packing (hoisted out of the forward pass).

    Each conv weight (Cout, Cin, 5, 5) is expanded into 5 per-ky reflect-Toeplitz
    matrices (W*C, W*C): Wk[ky][xin*C+ci, xout*C+co] = sum over kx with
    reflect(xout+kx-2)==xin of w[co,ci,ky,kx].  This folds the 5x5 conv and the
    column part of ReflectionPad2d(2) into lane-dense matmuls.  Layer 0 (Cin=1)
    is zero-padded to Cin=16 (matching zero-padded input channels).  The conv
    bias is dropped (cancelled by training-mode BatchNorm).
    """
    S = _col_reflect_mats(W)                                       # (KS, W, W)
    wk_list, gb_list = [], []
    for (w, _bias, gamma, beta) in params:
        cin = w.shape[1]
        if cin < NDF:
            w = jnp.pad(w, ((0, 0), (0, NDF - cin), (0, 0), (0, 0)))
        wt = jnp.transpose(w, (2, 3, 1, 0))                        # (ky, kx, ci, co)
        wk = jnp.einsum("axy,kaio->kxiyo", S, wt)                  # (ky, xin, ci, xout, co)
        wk_list.append(wk.reshape(KS, W * NDF, W * NDF))
        gb_list.append(jnp.stack([gamma, beta], axis=0))           # (2, C)
    rt = jnp.tile(jnp.eye(NDF, dtype=jnp.float32), (1, W))         # (C, W*C)
    return (jnp.stack(wk_list).astype(jnp.float32),                # (L, 5, W*C, W*C)
            jnp.stack(gb_list).astype(jnp.float32),                # (L, 2, C)
            rt)


# --------------------------------- forward -----------------------------------

@jax.jit
def restore_net_forward(x_nchw, packed):
    """RestoreNet.m0 forward: (N, 1, H, W) NCHW -> (N, 16, H, W) NCHW."""
    wk, gb, rt = packed
    N, cin, H, W = x_nchw.shape
    assert H >= 3 and W >= 3, "ReflectionPad2d(2) requires H, W >= 3"
    x = jnp.transpose(x_nchw, (0, 2, 3, 1)).astype(jnp.float32)    # NCHW -> NHWC
    x = jnp.pad(x, ((0, 0), (0, 0), (0, 0), (0, NDF - cin)))       # chans -> 16 (zeros)
    x2d = x.reshape(N * H, W * NDF)                                # lane-dense (32, 256)

    kern = functools.partial(_restore_net_kernel, N=N, H=H, W=W)
    out2d = pl.pallas_call(
        kern,
        grid=(N_LAYERS,),
        out_shape=jax.ShapeDtypeStruct((N * H, W * NDF), jnp.float32),
        in_specs=[
            pl.BlockSpec((N * H, W * NDF), lambda l: (0, 0)),              # input
            pl.BlockSpec((1, KS, W * NDF, W * NDF), lambda l: (l, 0, 0, 0)),  # weights (pipelined per layer)
            pl.BlockSpec((1, 2, NDF), lambda l: (l, 0, 0)),                # BN gamma/beta
            pl.BlockSpec((NDF, W * NDF), lambda l: (0, 0)),                # replication matrix
        ],
        out_specs=pl.BlockSpec((N * H, W * NDF), lambda l: (0, 0)),
        scratch_shapes=[pltpu.VMEM((N, H + 2 * PAD, W * NDF), jnp.float32)],
        compiler_params=pltpu.CompilerParams(
            dimension_semantics=("arbitrary",),
            vmem_limit_bytes=32 * 1024 * 1024),
    )(x2d, wk, gb, rt)

    out = out2d.reshape(N, H, W, NDF)
    return jnp.transpose(out, (0, 3, 1, 2))                        # NHWC -> NCHW


# ------------------------- pure-JAX reference (for checking) -----------------

def restore_net_reference(x_nchw, params):
    h = x_nchw.astype(jnp.float32)
    for idx, (w, b, gamma, beta) in enumerate(params):
        hp = jnp.pad(h, ((0, 0), (0, 0), (PAD, PAD), (PAD, PAD)), mode="reflect")
        y = jax.lax.conv_general_dilated(
            hp, w, window_strides=(1, 1), padding="VALID",
            dimension_numbers=("NCHW", "OIHW", "NCHW"))
        y = y + b.reshape(1, -1, 1, 1)
        mean = jnp.mean(y, axis=(0, 2, 3), keepdims=True)
        var = jnp.mean(jnp.square(y - mean), axis=(0, 2, 3), keepdims=True)
        y = (y - mean) * jax.lax.rsqrt(var + EPS)
        y = y * gamma.reshape(1, -1, 1, 1) + beta.reshape(1, -1, 1, 1)
        h = jax.nn.sigmoid(y) if idx == N_LAYERS - 1 else jnp.maximum(y, 0.0)
    return h


if __name__ == "__main__":
    key = jax.random.PRNGKey(0)
    k_param, k_x = jax.random.split(key)

    params = init_params(k_param)
    x = jax.random.normal(k_x, (2, 1, 16, 16), jnp.float32)  # (N, C=1, H, W) as in PyTorch
    packed = pack_params(params, W=x.shape[3])

    out = restore_net_forward(x, packed)
    out = jax.block_until_ready(out)

    assert out.shape == (2, NDF, 16, 16), out.shape
    assert out.dtype == jnp.float32
    assert bool(jnp.all(jnp.isfinite(out)))
    # last block ends with Sigmoid -> outputs in (0, 1)
    assert bool(jnp.all(out >= 0.0)) and bool(jnp.all(out <= 1.0))

    # correctness vs a pure-JAX reference of the PyTorch module (f32)
    ref = jax.jit(restore_net_reference)(x, params)
    ref = jax.block_until_ready(ref)
    max_err = float(jnp.max(jnp.abs(out - ref)))
    assert bool(jnp.allclose(out, ref, rtol=1e-3, atol=1e-3)), max_err

    print("KERNEL_OK")
</pallas_src>

<mosaic_0001>
module attributes {stable_mosaic.version = 11 : i64} {
  func.func @_restore_net_kernel(%arg0: i32, %arg1: memref<32x256xf32, #tpu.memory_space<vmem>>, %arg2: memref<1x5x256x256xf32, #tpu.memory_space<vmem>>, %arg3: memref<1x2x16xf32, #tpu.memory_space<vmem>>, %arg4: memref<16x256xf32, #tpu.memory_space<vmem>>, %arg5: memref<32x256xf32, #tpu.memory_space<vmem>>, %arg6: memref<2x20x256xf32, #tpu.memory_space<vmem>>) attributes {dimension_semantics = [#tpu.dimension_semantics<arbitrary>], iteration_bounds = array<i64: 10>, scalar_prefetch = 0 : i64, scratch_operands = 1 : i64, tpu.core_type = #tpu.core_type<tc>, window_params = [{pipeline_mode = #tpu.pipeline_mode<synchronous>, transform_indices = @transform_0, window_bounds = array<i64: 32, 256>}, {transform_indices = @transform_1, window_bounds = array<i64: 1, 5, 256, 256>}, {transform_indices = @transform_2, window_bounds = array<i64: 1, 2, 16>}, {pipeline_mode = #tpu.pipeline_mode<synchronous>, transform_indices = @transform_3, window_bounds = array<i64: 16, 256>}, {pipeline_mode = #tpu.pipeline_mode<synchronous>, transform_indices = @transform_4, window_bounds = array<i64: 32, 256>}]} {
    %c0_i32 = arith.constant 0 : i32
    %0 = arith.cmpi eq, %arg0, %c0_i32 : i32
    %1 = arith.extui %0 : i1 to i32
    %c0_i32_0 = arith.constant 0 : i32
    %2 = arith.cmpi ne, %1, %c0_i32_0 : i32
    scf.if %2 {
      %c0_75 = arith.constant 0 : index
      %c0_76 = arith.constant 0 : index
      %84 = vector.load %arg1[%c0_75, %c0_76] : memref<32x256xf32, #tpu.memory_space<vmem>>, vector<32x256xf32>
      %85 = vector.shape_cast %84 : vector<32x256xf32> to vector<2x16x256xf32>
      %c0_77 = arith.constant 0 : index
      %c2_78 = arith.constant 2 : index
      %c0_79 = arith.constant 0 : index
      %86 = vector.load %arg6[%c0_77, %c2_78, %c0_79] : memref<2x20x256xf32, #tpu.memory_space<vmem>>, vector<2x16x256xf32>
      tpu.vector_store %arg6[%c0_77, %c2_78, %c0_79], %85 {strides = array<i32>} : memref<2x20x256xf32, #tpu.memory_space<vmem>>, vector<2x16x256xf32>,
    } else {
    }
    %c0 = arith.constant 0 : index
    %c4 = arith.constant 4 : index
    %c0_1 = arith.constant 0 : index
    %3 = vector.load %arg6[%c0, %c4, %c0_1] : memref<2x20x256xf32, #tpu.memory_space<vmem>>, vector<2x1x256xf32>
    %c0_2 = arith.constant 0 : index
    %c0_3 = arith.constant 0 : index
    %c0_4 = arith.constant 0 : index
    %4 = vector.load %arg6[%c0_2, %c0_3, %c0_4] : memref<2x20x256xf32, #tpu.memory_space<vmem>>, vector<2x1x256xf32>
    tpu.vector_store %arg6[%c0_2, %c0_3, %c0_4], %3 {strides = array<i32>} : memref<2x20x256xf32, #tpu.memory_space<vmem>>, vector<2x1x256xf32>,
    %c0_5 = arith.constant 0 : index
    %c3 = arith.constant 3 : index
    %c0_6 = arith.constant 0 : index
    %5 = vector.load %arg6[%c0_5, %c3, %c0_6] : memref<2x20x256xf32, #tpu.memory_space<vmem>>, vector<2x1x256xf32>
    %c0_7 = arith.constant 0 : index
    %c1 = arith.constant 1 : index
    %c0_8 = arith.constant 0 : index
    %6 = vector.load %arg6[%c0_7, %c1, %c0_8] : memref<2x20x256xf32, #tpu.memory_space<vmem>>, vector<2x1x256xf32>
    tpu.vector_store %arg6[%c0_7, %c1, %c0_8], %5 {strides = array<i32>} : memref<2x20x256xf32, #tpu.memory_space<vmem>>, vector<2x1x256xf32>,
    %c0_9 = arith.constant 0 : index
    %c16 = arith.constant 16 : index
    %c0_10 = arith.constant 0 : index
    %7 = vector.load %arg6[%c0_9, %c16, %c0_10] : memref<2x20x256xf32, #tpu.memory_space<vmem>>, vector<2x1x256xf32>
    %c0_11 = arith.constant 0 : index
    %c18 = arith.constant 18 : index
    %c0_12 = arith.constant 0 : index
    %8 = vector.load %arg6[%c0_11, %c18, %c0_12] : memref<2x20x256xf32, #tpu.memory_space<vmem>>, vector<2x1x256xf32>
    tpu.vector_store %arg6[%c0_11, %c18, %c0_12], %7 {strides = array<i32>} : memref<2x20x256xf32, #tpu.memory_space<vmem>>, vector<2x1x256xf32>,
    %c0_13 = arith.constant 0 : index
    %c15 = arith.constant 15 : index
    %c0_14 = arith.constant 0 : index
    %9 = vector.load %arg6[%c0_13, %c15, %c0_14] : memref<2x20x256xf32, #tpu.memory_space<vmem>>, vector<2x1x256xf32>
    %c0_15 = arith.constant 0 : index
    %c19 = arith.constant 19 : index
    %c0_16 = arith.constant 0 : index
    %10 = vector.load %arg6[%c0_15, %c19, %c0_16] : memref<2x20x256xf32, #tpu.memory_space<vmem>>, vector<2x1x256xf32>
    tpu.vector_store %arg6[%c0_15, %c19, %c0_16], %9 {strides = array<i32>} : memref<2x20x256xf32, #tpu.memory_space<vmem>>, vector<2x1x256xf32>,
    %cst = arith.constant 0.000000e+00 : f32
    %11 = vector.broadcast %cst : f32 to vector<32x256xf32>
    %c0_17 = arith.constant 0 : index
    %c0_18 = arith.constant 0 : index
    %c0_19 = arith.constant 0 : index
    %12 = vector.load %arg6[%c0_17, %c0_18, %c0_19] : memref<2x20x256xf32, #tpu.memory_space<vmem>>, vector<2x16x256xf32>
    %13 = vector.shape_cast %12 : vector<2x16x256xf32> to vector<32x256xf32>
    %c0_20 = arith.constant 0 : index
    %c0_21 = arith.constant 0 : index
    %c0_22 = arith.constant 0 : index
    %c0_23 = arith.constant 0 : index
    %14 = vector.load %arg2[%c0_20, %c0_21, %c0_22, %c0_23] : memref<1x5x256x256xf32, #tpu.memory_space<vmem>>, vector<1x1x256x256xf32>
    %15 = vector.shape_cast %14 : vector<1x1x256x256xf32> to vector<256x256xf32>
    %cst_24 = arith.constant dense<0.000000e+00> : vector<32x256xf32>
    %16 = tpu.matmul %13, %15, %cst_24 {dimension_numbers = #tpu.dot_dimension_numbers<[1], [0], [0], [1], [0, 0, 1, 1], [], []>} : vector<32x256xf32>, vector<256x256xf32>, vector<32x256xf32> -> vector<32x256xf32>
    %17 = arith.addf %11, %16 : vector<32x256xf32>
    %c0_25 = arith.constant 0 : index
    %c1_26 = arith.constant 1 : index
    %c0_27 = arith.constant 0 : index
    %18 = vector.load %arg6[%c0_25, %c1_26, %c0_27] : memref<2x20x256xf32, #tpu.memory_space<vmem>>, vector<2x16x256xf32>
    %19 = vector.shape_cast %18 : vector<2x16x256xf32> to vector<32x256xf32>
    %c0_28 = arith.constant 0 : index
    %c1_29 = arith.constant 1 : index
    %c0_30 = arith.constant 0 : index
    %c0_31 = arith.constant 0 : index
    %20 = vector.load %arg2[%c0_28, %c1_29, %c0_30, %c0_31] : memref<1x5x256x256xf32, #tpu.memory_space<vmem>>, vector<1x1x256x256xf32>
    %21 = vector.shape_cast %20 : vector<1x1x256x256xf32> to vector<256x256xf32>
    %cst_32 = arith.constant dense<0.000000e+00> : vector<32x256xf32>
    %22 = tpu.matmul %19, %21, %cst_32 {dimension_numbers = #tpu.dot_dimension_numbers<[1], [0], [0], [1], [0, 0, 1, 1], [], []>} : vector<32x256xf32>, vector<256x256xf32>, vector<32x256xf32> -> vector<32x256xf32>
    %23 = arith.addf %17, %22 : vector<32x256xf32>
    %c0_33 = arith.constant 0 : index
    %c2 = arith.constant 2 : index
    %c0_34 = arith.constant 0 : index
    %24 = vector.load %arg6[%c0_33, %c2, %c0_34] : memref<2x20x256xf32, #tpu.memory_space<vmem>>, vector<2x16x256xf32>
    %25 = vector.shape_cast %24 : vector<2x16x256xf32> to vector<32x256xf32>
    %c0_35 = arith.constant 0 : index
    %c2_36 = arith.constant 2 : index
    %c0_37 = arith.constant 0 : index
    %c0_38 = arith.constant 0 : index
    %26 = vector.load %arg2[%c0_35, %c2_36, %c0_37, %c0_38] : memref<1x5x256x256xf32, #tpu.memory_space<vmem>>, vector<1x1x256x256xf32>
    %27 = vector.shape_cast %26 : vector<1x1x256x256xf32> to vector<256x256xf32>
    %cst_39 = arith.constant dense<0.000000e+00> : vector<32x256xf32>
    %28 = tpu.matmul %25, %27, %cst_39 {dimension_numbers = #tpu.dot_dimension_numbers<[1], [0], [0], [1], [0, 0, 1, 1], [], []>} : vector<32x256xf32>, vector<256x256xf32>, vector<32x256xf32> -> vector<32x256xf32>
    %29 = arith.addf %23, %28 : vector<32x256xf32>
    %c0_40 = arith.constant 0 : index
    %c3_41 = arith.constant 3 : index
    %c0_42 = arith.constant 0 : index
    %30 = vector.load %arg6[%c0_40, %c3_41, %c0_42] : memref<2x20x256xf32, #tpu.memory_space<vmem>>, vector<2x16x256xf32>
    %31 = vector.shape_cast %30 : vector<2x16x256xf32> to vector<32x256xf32>
    %c0_43 = arith.constant 0 : index
    %c3_44 = arith.constant 3 : index
    %c0_45 = arith.constant 0 : index
    %c0_46 = arith.constant 0 : index
    %32 = vector.load %arg2[%c0_43, %c3_44, %c0_45, %c0_46] : memref<1x5x256x256xf32, #tpu.memory_space<vmem>>, vector<1x1x256x256xf32>
    %33 = vector.shape_cast %32 : vector<1x1x256x256xf32> to vector<256x256xf32>
    %cst_47 = arith.constant dense<0.000000e+00> : vector<32x256xf32>
    %34 = tpu.matmul %31, %33, %cst_47 {dimension_numbers = #tpu.dot_dimension_numbers<[1], [0], [0], [1], [0, 0, 1, 1], [], []>} : vector<32x256xf32>, vector<256x256xf32>, vector<32x256xf32> -> vector<32x256xf32>
    %35 = arith.addf %29, %34 : vector<32x256xf32>
    %c0_48 = arith.constant 0 : index
    %c4_49 = arith.constant 4 : index
    %c0_50 = arith.constant 0 : index
    %36 = vector.load %arg6[%c0_48, %c4_49, %c0_50] : memref<2x20x256xf32, #tpu.memory_space<vmem>>, vector<2x16x256xf32>
    %37 = vector.shape_cast %36 : vector<2x16x256xf32> to vector<32x256xf32>
    %c0_51 = arith.constant 0 : index
    %c4_52 = arith.constant 4 : index
    %c0_53 = arith.constant 0 : index
    %c0_54 = arith.constant 0 : index
    %38 = vector.load %arg2[%c0_51, %c4_52, %c0_53, %c0_54] : memref<1x5x256x256xf32, #tpu.memory_space<vmem>>, vector<1x1x256x256xf32>
    %39 = vector.shape_cast %38 : vector<1x1x256x256xf32> to vector<256x256xf32>
    %cst_55 = arith.constant dense<0.000000e+00> : vector<32x256xf32>
    %40 = tpu.matmul %37, %39, %cst_55 {dimension_numbers = #tpu.dot_dimension_numbers<[1], [0], [0], [1], [0, 0, 1, 1], [], []>} : vector<32x256xf32>, vector<256x256xf32>, vector<32x256xf32> -> vector<32x256xf32>
    %41 = arith.addf %35, %40 : vector<32x256xf32>
    %c0_56 = arith.constant 0 : index
    %c0_57 = arith.constant 0 : index
    %42 = vector.load %arg4[%c0_56, %c0_57] : memref<16x256xf32, #tpu.memory_space<vmem>>, vector<16x256xf32>
    %cst_58 = arith.constant dense<0.000000e+00> : vector<256xf32>
    %43 = vector.multi_reduction <add>, %41, %cst_58 [0] : vector<32x256xf32> to vector<256xf32>
    %44 = vector.shape_cast %43 : vector<256xf32> to vector<1x256xf32>
    %45 = arith.mulf %41, %41 : vector<32x256xf32>
    %cst_59 = arith.constant dense<0.000000e+00> : vector<256xf32>
    %46 = vector.multi_reduction <add>, %45, %cst_59 [0] : vector<32x256xf32> to vector<256xf32>
    %47 = vector.shape_cast %46 : vector<256xf32> to vector<1x256xf32>
    %48 = tpu.concatenate %44, %47 in 0 : vector<1x256xf32>, vector<1x256xf32> -> vector<2x256xf32>
    %cst_60 = arith.constant dense<0.000000e+00> : vector<2x16xf32>
    %49 = tpu.matmul %48, %42, %cst_60 {dimension_numbers = #tpu.dot_dimension_numbers<[1], [1], [0], [0], [0, 0, 1, 0], [], []>} : vector<2x256xf32>, vector<16x256xf32>, vector<2x16xf32> -> vector<2x16xf32>
    %50 = vector.extract_strided_slice %49 {offsets = [0, 0], sizes = [1, 16], strides = [1, 1]} : vector<2x16xf32> to vector<1x16xf32>
    %cst_61 = arith.constant 0.001953125 : f32
    %51 = vector.broadcast %cst_61 : f32 to vector<1x16xf32>
    %52 = arith.mulf %50, %51 : vector<1x16xf32>
    %53 = vector.extract_strided_slice %49 {offsets = [1, 0], sizes = [1, 16], strides = [1, 1]} : vector<2x16xf32> to vector<1x16xf32>
    %cst_62 = arith.constant 0.001953125 : f32
    %54 = vector.broadcast %cst_62 : f32 to vector<1x16xf32>
    %55 = arith.mulf %53, %54 : vector<1x16xf32>
    %56 = arith.mulf %52, %52 : vector<1x16xf32>
    %57 = arith.subf %55, %56 : vector<1x16xf32>
    %cst_63 = arith.constant 0.000000e+00 : f32
    %58 = vector.broadcast %cst_63 : f32 to vector<1x16xf32>
    %59 = arith.maximumf %57, %58 : vector<1x16xf32>
    %c0_64 = arith.constant 0 : index
    %c0_65 = arith.constant 0 : index
    %c0_66 = arith.constant 0 : index
    %60 = vector.load %arg3[%c0_64, %c0_65, %c0_66] : memref<1x2x16xf32, #tpu.memory_space<vmem>>, vector<1x1x16xf32>
    %61 = vector.shape_cast %60 : vector<1x1x16xf32> to vector<1x16xf32>
    %c0_67 = arith.constant 0 : index
    %c1_68 = arith.constant 1 : index
    %c0_69 = arith.constant 0 : index
    %62 = vector.load %arg3[%c0_67, %c1_68, %c0_69] : memref<1x2x16xf32, #tpu.memory_space<vmem>>, vector<1x1x16xf32>
    %63 = vector.shape_cast %62 : vector<1x1x16xf32> to vector<1x16xf32>
    %cst_70 = arith.constant 9.99999974E-6 : f32
    %64 = vector.broadcast %cst_70 : f32 to vector<1x16xf32>
    %65 = arith.addf %59, %64 : vector<1x16xf32>
    %66 = math.rsqrt %65 : vector<1x16xf32>
    %67 = arith.mulf %61, %66 : vector<1x16xf32>
    %68 = arith.mulf %52, %67 : vector<1x16xf32>
    %69 = arith.subf %63, %68 : vector<1x16xf32>
    %70 = tpu.concatenate %67, %69 in 0 : vector<1x16xf32>, vector<1x16xf32> -> vector<2x16xf32>
    %cst_71 = arith.constant dense<0.000000e+00> : vector<2x256xf32>
    %71 = tpu.matmul %70, %42, %cst_71 {dimension_numbers = #tpu.dot_dimension_numbers<[1], [0], [0], [1], [0, 0, 1, 1], [], []>} : vector<2x16xf32>, vector<16x256xf32>, vector<2x256xf32> -> vector<2x256xf32>
    %72 = vector.extract_strided_slice %71 {offsets = [0, 0], sizes = [1, 256], strides = [1, 1]} : vector<2x256xf32> to vector<1x256xf32>
    %73 = vector.broadcast %72 : vector<1x256xf32> to vector<32x256xf32>
    %74 = arith.mulf %41, %73 : vector<32x256xf32>
    %75 = vector.extract_strided_slice %71 {offsets = [1, 0], sizes = [1, 256], strides = [1, 1]} : vector<2x256xf32> to vector<1x256xf32>
    %76 = vector.broadcast %75 : vector<1x256xf32> to vector<32x256xf32>
    %77 = arith.addf %74, %76 : vector<32x256xf32>
    %c9_i32 = arith.constant 9 : i32
    %78 = arith.cmpi slt, %arg0, %c9_i32 : i32
    %79 = arith.extui %78 : i1 to i32
    %c0_i32_72 = arith.constant 0 : i32
    %80 = arith.cmpi ne, %79, %c0_i32_72 : i32
    scf.if %80 {
      %cst_75 = arith.constant 0.000000e+00 : f32
      %84 = vector.broadcast %cst_75 : f32 to vector<32x256xf32>
      %85 = arith.maximumf %77, %84 : vector<32x256xf32>
      %86 = vector.shape_cast %85 : vector<32x256xf32> to vector<2x16x256xf32>
      %c0_76 = arith.constant 0 : index
      %c2_77 = arith.constant 2 : index
      %c0_78 = arith.constant 0 : index
      %87 = vector.load %arg6[%c0_76, %c2_77, %c0_78] : memref<2x20x256xf32, #tpu.memory_space<vmem>>, vector<2x16x256xf32>
      tpu.vector_store %arg6[%c0_76, %c2_77, %c0_78], %86 {strides = array<i32>} : memref<2x20x256xf32, #tpu.memory_space<vmem>>, vector<2x16x256xf32>,
    } else {
    }
    %c9_i32_73 = arith.constant 9 : i32
    %81 = arith.cmpi eq, %arg0, %c9_i32_73 : i32
    %82 = arith.extui %81 : i1 to i32
    %c0_i32_74 = arith.constant 0 : i32
    %83 = arith.cmpi ne, %82, %c0_i32_74 : i32
    scf.if %83 {
      %84 = arith.negf %77 : vector<32x256xf32>
      %85 = math.exp %84 : vector<32x256xf32>
      %cst_75 = arith.constant 1.000000e+00 : f32
      %86 = vector.broadcast %cst_75 : f32 to vector<32x256xf32>
      %87 = arith.addf %86, %85 : vector<32x256xf32>
      %88 = arith.divf %86, %87 : vector<32x256xf32>
      %c0_76 = arith.constant 0 : index
      %c0_77 = arith.constant 0 : index
      %89 = vector.load %arg5[%c0_76, %c0_77] : memref<32x256xf32, #tpu.memory_space<vmem>>, vector<32x256xf32>
      tpu.vector_store %arg5[%c0_76, %c0_77], %88 {strides = array<i32>} : memref<32x256xf32, #tpu.memory_space<vmem>>, vector<32x256xf32>,
    } else {
    }
    return
  }
  func.func @transform_0(%arg0: i32) -> (i32, i32) {
    %c0_i32 = arith.constant 0 : i32
    %c0_i32_0 = arith.constant 0 : i32
    %c0_i32_1 = arith.constant 0 : i32
    return %c0_i32, %c0_i32_0 : i32, i32
  }
  func.func @transform_1(%arg0: i32) -> (i32, i32, i32, i32) {
    %c0_i32 = arith.constant 0 : i32
    %c0_i32_0 = arith.constant 0 : i32
    %c0_i32_1 = arith.constant 0 : i32
    %c0_i32_2 = arith.constant 0 : i32
    return %arg0, %c0_i32, %c0_i32_0, %c0_i32_1 : i32, i32, i32, i32
  }
  func.func @transform_2(%arg0: i32) -> (i32, i32, i32) {
    %c0_i32 = arith.constant 0 : i32
    %c0_i32_0 = arith.constant 0 : i32
    %c0_i32_1 = arith.constant 0 : i32
    return %arg0, %c0_i32, %c0_i32_0 : i32, i32, i32
  }
  func.func @transform_3(%arg0: i32) -> (i32, i32) {
    %c0_i32 = arith.constant 0 : i32
    %c0_i32_0 = arith.constant 0 : i32
    %c0_i32_1 = arith.constant 0 : i32
    return %c0_i32, %c0_i32_0 : i32, i32
  }
  func.func @transform_4(%arg0: i32) -> (i32, i32) {
    %c0_i32 = arith.constant 0 : i32
    %c0_i32_0 = arith.constant 0 : i32
    %c0_i32_1 = arith.constant 0 : i32
    return %c0_i32, %c0_i32_0 : i32, i32
  }
}

</mosaic_0001>

<bundles_post_ra>
// kernel: restore_net_forward.1
= control target key start
LH: loop header
LB: loop body
LE: loop exit
PB: predicated region body
PF: predicated region fallthrough
CT: control target
= control target key end

     0   :  { %9 = vsyncpa [#allocation4], 0  ;;  %s3424_s0 = inlined_call_operand.vmem [shape: f32[32,256], index: 0, kind: input, shape index: {}]   ;;  %s3425_s1 = inlined_call_operand.hbm [shape: f32[10,5,256,256], index: 1, kind: input, shape index: {}]   ;;  %s3426_s2 = inlined_call_operand.hbm [shape: f32[10,2,16], index: 2, kind: input, shape index: {}]   ;;  %s3427_s3 = inlined_call_operand.hbm [shape: f32[16,256], index: 3, kind: input, shape index: {}]   ;;  %s3428_s4 = inlined_call_operand.vmem [shape: f32[32,256], index: 4, kind: output, shape index: {}]  }
   0x1   :  { %11 = vsyncpa [#allocation4 + $0x1], 0 }
   0x2   :  { %12 = vsyncpa [#allocation6], 0 }
   0x3   :  { %14 = vsyncpa [#allocation6 + $0x1], 0  ;;  %s2675_s15 = smov 0   ;;  %s2677_s16 = smov 0  }
   0x4   :  { %s2679_s17 = smov 0   ;;  %s2681_s18 = smov 0  }
   0x5 LB: > { %s2694_s19 = sadd.s32 4294967295, %s2642_s18   ;;  %p61_p0 = scmp.ne.s32.totalorder %s2634_s16, %s2630_s15  ;;  %s2642_s18 = sphi %s2681_s18, %s3446_s18   ;;  %s2638_s17 = sphi %s2679_s17, %s3445_s17   ;;  %s2634_s16 = sphi %s2677_s16, %s3444_s16   ;;  %s2630_s15 = sphi %s2675_s15, %s3443_s15  }
   0x6   : > { %p3429_p1 = scmp.eq.s32.totalorder %s2694_s19, 0  ;;  %p1777_p2 = scmp.ge.s32.totalorder %s2642_s18, 1 }
   0x7   : > { %p140_p3 = scmp.lt.s32.totalorder %s2642_s18, 11  ;;  %s2644_s22 = smov [#allocation7]  }
   0x8   : > { %p2703_p5 = por %p3429_p1, %p61_p0  ;;  %s155_s23 = sshll.u32 %s2644_s22, 4  ;;  %s156_s23 = int_to_ptr.vmem [resolvable:$true] %s155_s23 }
   0x9   : > { %p2707_p6 = pnand %p1777_p2, %p140_p3  ;;  %s2720_s25 = sadd.s32 1, %s2642_s18  }
   0xa   : > { %s3432_s20 = scalar_select %p2703_p5, 1, 0 }
   0xb   : > { %s3433_s21 = scalar_select %p2707_p6, 1, 0 }
   0xc   : > { %p2427_p7 = pneg %p2707_p6  ;;  %s48_s26 = sadd.s32 1, %s2638_s17 }
   0xd   : > { %s45_s27 = ssub.s32 %s2642_s18, %s2720_s25  ;;  %s2512_s30 = scalar_lea.hbm %s3427_s3, 512 }
   0xe   : > { %p2715_p8 = pnand %p2427_p7, %p3429_p1  ;;  %p2513_p9 = scmp.ne.s32.totalorder %s3427_s3, %s2512_s30 }
   0xf   : > { %p2519_p13 = scmp.lt.u32.totalorder %s2512_s30, %s3427_s3 }
  0x10   : > { %p2514_p10 = pneg %p2715_p8 }
  0x12   : > { %p2515_p11 = pnand %p2514_p10, %p2513_p9 }
  0x14   : > { %p2516_p12 = pneg %p2515_p11 }
  0x16   : > { %p2521_p0 = pnand %p2519_p13, %p2516_p12 }
  0x18   : > { %2524 = shalt.err (!%p2521_p0)
}
  0x19   : > { %s2525_s9 = scalar_lea.vmem %s156_s23, 512  ;;  %p2533_p4 = scmp.lt.s32.totalorder %s156_s23, %s156_s23 }
  0x1a   : > { %p2526_p2 = scmp.ne.s32.totalorder %s156_s23, %s2525_s9  ;;  %p2534_p1 = scmp.lt.s32.totalorder %s2525_s9, %s2525_s9 }
  0x1c   : > { %p2528_p3 = pnand %p2526_p2, %p2514_p10  ;;  %p2535_p5 = por %p2534_p1, %p2533_p4 }
  0x1e   : > { %p2529_p7 = pneg %p2528_p3 }
  0x20   : > { %p2536_p6 = pnand %p2535_p5, %p2529_p7 }
  0x22   : > { %2539 = shalt.err (!%p2536_p6)
}
  0x23   : > { %s2645_s10 = smov 256   ;;  %s2646_s11 = smov 16  }
  0x24   : > { %2430 = dma.hbm_to_vmem [thread:$0]  (!%p2715_p8), %s3427_s3, 512, %s156_s23, [#allocation6], %s2645_s10, %s2645_s10, %s2646_s11  }
  0x25   : > { %p46_p1 = scmp.eq.s32.totalorder %s45_s27, 0  ;;  %p55_p4 = scmp.ne.s32.totalorder %s2638_s17, %s2634_s16 }
  0x26   : > { %p56_p5 = scmp.eq.s32.totalorder %s2642_s18, 0  ;;  %p2439_p6 = scmp.lt.s32.totalorder %s2642_s18, 10 }
  0x27   : > { %s2749_s14 = scalar_select %p46_p1, %s2638_s17, %s48_s26  }
  0x28   : > { %p57_p9 = por %p56_p5, %p55_p4  ;;  %s2752_s15 = sand.u32 1, %s2638_s17  }
  0x29   : > { %s2416_s22 = smul.u32 2560, %s2752_s15  ;;  %s190_s23 = sand.u32 1, %s2642_s18  }
  0x2a   : > { %s2417_s24 = smul.u32 40960, %s2642_s18  ;;  %p2756_p10 = pnand %p2439_p6, %p57_p9 }
  0x2b   : > { %s173_s26 = scalar_lea.vmem [#allocation3], %s2416_s22  ;;  %s170_s6 = scalar_lea.sflag [#allocation4], %s2752_s15 }
  0x2c   : > { %s2764_s30 = scalar_lea.hbm %s3425_s1, %s2417_s24  ;;  %s180_s5 = sshll.u32 %s173_s26, 4  ;;  %s2766_s5 = int_to_ptr.vmem [resolvable:$true] %s180_s5 }
  0x2d   : > { %s2540_s7 = scalar_lea.hbm %s2764_s30, 40960  ;;  %p2542_p11 = pneg %p2756_p10 }
  0x2e   : > { %p2541_p8 = scmp.ne.s32.totalorder %s2764_s30, %s2540_s7  ;;  %s2545_s12 = scalar_lea.hbm %s3425_s1, 409600 }
  0x2f   : > { %p2546_p0 = scmp.lt.u32.totalorder %s2764_s30, %s3425_s1  ;;  %p2547_p2 = scmp.lt.u32.totalorder %s2545_s12, %s2540_s7 }
  0x30   : > { %p2543_p12 = pnand %p2542_p11, %p2541_p8  ;;  %p2549_p7 = scmp.lt.u32.totalorder %s2540_s7, %s2764_s30 }
  0x31   : > { %p2548_p3 = por %p2547_p2, %p2546_p0 }
  0x32   : > { %p2544_p13 = pneg %p2543_p12 }
  0x33   : > { %p2550_p1 = por %p2549_p7, %p2548_p3 }
  0x35   : > { %p2551_p4 = pnand %p2550_p1, %p2544_p13 }
  0x37   : > { %2554 = shalt.err (!%p2551_p4)
}
  0x38   : > { %s2555_s22 = scalar_lea.vmem %s2766_s5, 40960  ;;  %s2647_s27 = smov [#allocation3]  }
  0x39   : > { %p2556_p5 = scmp.ne.s32.totalorder %s2766_s5, %s2555_s22  ;;  %s2560_s29 = sshll.u32 %s2647_s27, 4  ;;  %s2561_s29 = int_to_ptr.vmem [resolvable:$false] %s2560_s29 }
  0x3a   : > { %s2562_s26 = scalar_lea.vmem %s2561_s29, 81920  ;;  %p2563_p8 = scmp.lt.s32.totalorder %s2766_s5, %s2561_s29 }
  0x3b   : > { %p2558_p6 = pnand %p2556_p5, %p2542_p11  ;;  %p2564_p12 = scmp.lt.s32.totalorder %s2562_s26, %s2555_s22 }
  0x3d   : > { %p2559_p9 = pneg %p2558_p6  ;;  %p2565_p0 = por %p2564_p12, %p2563_p8 }
  0x3f   : > { %p2566_p2 = pnand %p2565_p0, %p2559_p9 }
  0x41   : > { %2569 = shalt.err (!%p2566_p2)
}
  0x42   : > { %2434 = dma.hbm_to_vmem [thread:$0]  (!%p2756_p10), %s2764_s30, 40960, %s2766_s5, %s170_s6, %s2645_s10, %s2645_s10, %s2646_s11  }
  0x43   : > { %s1781_s7 = sshll.u32 %s2752_s15, 1  ;;  %s1782_s8 = sshll.u32 %s2642_s18, 5 }
  0x44   : > { %s2804_s13 = scalar_lea.hbm %s3426_s2, %s1782_s8  ;;  %s194_s24 = scalar_lea.vmem [#allocation5], %s1781_s7 }
  0x45   : > { %s201_s22 = sshll.u32 %s194_s24, 4  ;;  %s191_s27 = scalar_lea.sflag [#allocation6], %s190_s23  ;;  %s202_s22 = int_to_ptr.vmem [resolvable:$true] %s201_s22 }
  0x46   : > { %s2570_s29 = scalar_lea.hbm %s2804_s13, 32  ;;  %s2575_s15 = scalar_lea.hbm %s3426_s2, 320 }
  0x47   : > { %p2571_p13 = scmp.ne.s32.totalorder %s2804_s13, %s2570_s29  ;;  %p2576_p1 = scmp.lt.u32.totalorder %s2804_s13, %s3426_s2 }
  0x48   : > { %p2577_p4 = scmp.lt.u32.totalorder %s2575_s15, %s2570_s29  ;;  %p2579_p6 = scmp.lt.u32.totalorder %s2570_s29, %s2804_s13 }
  0x49   : > { %p2573_p3 = pnand %p2571_p13, %p2542_p11 }
  0x4a   : > { %p2578_p5 = por %p2577_p4, %p2576_p1 }
  0x4b   : > { %p2574_p7 = pneg %p2573_p3 }
  0x4c   : > { %p2580_p9 = por %p2579_p6, %p2578_p5 }
  0x4e   : > { %p2581_p8 = pnand %p2580_p9, %p2574_p7 }
  0x50   : > { %2584 = shalt.err (!%p2581_p8)
}
  0x51   : > { %s2585_s18 = scalar_lea.vmem %s202_s22, 32  ;;  %s2648_s23 = smov [#allocation5]  }
  0x52   : > { %p2586_p12 = scmp.ne.s32.totalorder %s202_s22, %s2585_s18  ;;  %s2590_s6 = sshll.u32 %s2648_s23, 4  ;;  %s2591_s6 = int_to_ptr.vmem [resolvable:$false] %s2590_s6 }
  0x53   : > { %s2592_s26 = scalar_lea.vmem %s2591_s6, 64  ;;  %p2593_p13 = scmp.lt.s32.totalorder %s202_s22, %s2591_s6 }
  0x54   : > { %p2588_p0 = pnand %p2586_p12, %p2542_p11  ;;  %p2594_p3 = scmp.lt.s32.totalorder %s2592_s26, %s2585_s18 }
  0x56   : > { %p2589_p2 = pneg %p2588_p0  ;;  %p2595_p1 = por %p2594_p3, %p2593_p13 }
  0x58   : > { %p2596_p4 = pnand %p2595_p1, %p2589_p2 }
  0x5a   : > { %2599 = shalt.err (!%p2596_p4)
}
  0x5b   : > { %2437 = dma.hbm_to_vmem [thread:$0]  (!%p2756_p10), %s2804_s13, 32, %s202_s22, %s191_s27  }
  0x5c   : > { %p3436_p7 = scmp.ne.s32.totalorder %s3433_s21, 0 }
  0x5d   : > { %s212_s7 = sand.u32 (!%p3436_p7), 1, %s2634_s16   ;;  %p3437_p11 = scmp.ne.s32.totalorder (!%p3436_p7), %s3432_s20, 0 }
  0x5e   : > { %210 = sbr.rel (%p3436_p7) target bundleno = 1068 (0x42c), region = 36  ;;  %s213_s9 = scalar_lea.sflag (!%p3436_p7), [#allocation4], %s212_s7 }
  0x5f   : > { %s2418_s8 = smul.u32 (!%p3436_p7), 2560, %s212_s7 }
  0x61   : > { %s2830_s12 = scalar_lea.vmem (!%p3436_p7), [#allocation3], %s2418_s8 }
  0x65   : > { %2617 = dma.done.wait (%p3437_p11), %s213_s9, 40960  }
  0x66   : > { %2619 = vsyncadd (%p3437_p11), %s213_s9, 4294926336  ;;  %s221_s28 = sand.u32 1, %s2694_s19   ;;  %s1784_s24 = sshll.u32 %s212_s7, 1 }
  0x67   : > { %s222_s13 = scalar_lea.sflag [#allocation6], %s221_s28  ;;  %s2837_s22 = scalar_lea.vmem [#allocation5], %s1784_s24 }
  0x68   : > { %2621 = dma.done.wait (%p3437_p11), %s222_s13, 32  }
  0x69   : > { %2623 = vsyncadd (%p3437_p11), %s222_s13, 4294967264  ;;  %p3438_p10 = scmp.eq.s32.totalorder %s2694_s19, 0 }
  0x6b   : > { %2625 = dma.done.wait (%p3438_p10), [#allocation6], 512   ;;  %p3439_p5 = pmov %p3438_p10 }
  0x6c   : > { %p3440_p6 = scmp.ne.s32.totalorder %s2694_s19, 0 }
  0x6d   : > { %2627 = vsyncadd (%p3439_p5), [#allocation6], 4294966784  ;;  %v258_v0 = vld [vmem:[%s3424_s0] sm:$0xff] (!%p3440_p6)  ;;  %v259_v1 = vld [vmem:[%s3424_s0 + $0x8] sm:$0xff] (!%p3440_p6)  ;;  %vm274_vm0 = vcmask (!%p3440_p6), 1041408  }
  0x6e   : > { %257 = sbr.rel (%p3440_p6) target bundleno = 118 (0x76), region = 52  ;;  %v260_v2 = vld [vmem:[%s3424_s0 + $0x10] sm:$0xff] (!%p3440_p6)  ;;  %v275_v3 = vrot.slane (!%p3440_p6), %v258_v0, 6  ;;  %v276_v4 = vrot.slane (!%p3440_p6), %v259_v1, 6  ;;  %v261_v6 = vld [vmem:[%s3424_s0 + $0x18] sm:$0xff] (!%p3440_p6)  ;;  %v262_v7 = vld [vmem:[%s3424_s0 + $0x20] sm:$0xff] (!%p3440_p6) }
  0x6f   : > { %v277_v5 = vrot.slane (!%p3440_p6), %v260_v2, 6  ;;  %v263_v8 = vld [vmem:[%s3424_s0 + $0x28] sm:$0xff] (!%p3440_p6)  ;;  %v279_v9 = vrot.slane (!%p3440_p6), %v261_v6, 6  ;;  %v281_v10 = vrot.slane (!%p3440_p6), %v262_v7, 6  ;;  %v264_v12 = vld [vmem:[%s3424_s0 + $0x30] sm:$0xff] (!%p3440_p6)  ;;  %v265_v13 = vld [vmem:[%s3424_s0 + $0x38] sm:$0xff] (!%p3440_p6) }
  0x70   : > { %v282_v11 = vrot.slane (!%p3440_p6), %v263_v8, 6  ;;  %299 = vst [vmem:[#allocation2] sm:$0xfc] (!%p3440_p6), %v275_v3  ;;  %300 = vst [vmem:[#allocation2 + $0x8] sm:$0xfc] (!%p3440_p6), %v276_v4  ;;  %v283_v15 = vrot.slane (!%p3440_p6), %v264_v12, 6 }
  0x71   : > { %v278_v14 = vsel (!%p3440_p6), %vm274_vm0, %v275_v3, %v277_v5  ;;  %303 = vst [vmem:[#allocation2 + $0x20] sm:$0x3] (!%p3440_p6), %v277_v5  ;;  %v285_v16 = vrot.slane (!%p3440_p6), %v265_v13, 6  ;;  %v280_v17 = vsel (!%p3440_p6), %vm274_vm0, %v276_v4, %v279_v9  ;;  %304 = vst [vmem:[#allocation2 + $0x28] sm:$0x3] (!%p3440_p6), %v279_v9 }
  0x72   : > { %301 = vst [vmem:[#allocation2 + $0x10] sm:$0xff] (!%p3440_p6), %v278_v14  ;;  %305 = vst [vmem:[#allocation2 + $0x30] sm:$0xfc] (!%p3440_p6), %v281_v10  ;;  %v284_v18 = vsel (!%p3440_p6), %vm274_vm0, %v281_v10, %v283_v15 }
  0x73   : > { %306 = vst [vmem:[#allocation2 + $0x38] sm:$0xfc] (!%p3440_p6), %v282_v11  ;;  %302 = vst [vmem:[#allocation2 + $0x18] sm:$0xff] (!%p3440_p6), %v280_v17  ;;  %v286_v19 = vsel (!%p3440_p6), %vm274_vm0, %v282_v11, %v285_v16 }
  0x74   : > { %309 = vst [vmem:[#allocation2 + $0x50] sm:$0x3] (!%p3440_p6), %v283_v15  ;;  %310 = vst [vmem:[#allocation2 + $0x58] sm:$0x3] (!%p3440_p6), %v285_v16 }
  0x75   : > { %307 = vst [vmem:[#allocation2 + $0x40] sm:$0xff] %v284_v18  ;;  %308 = vst [vmem:[#allocation2 + $0x48] sm:$0xff] %v286_v19 }
  0x76 PF: > { %v1788_v20 = vld [vmem:[%s2830_s12 + $0x208] sm:$0xff]  ;;  %v1790_v21 = vld [vmem:[%s2830_s12 + $0x218] sm:$0xff]  ;;  %v1787_v25 = vld [vmem:[%s2830_s12 + $0x200] sm:$0xff]  ;;  %vm734_vm2 = vcmask 1045504   ;;  %vm446_vm3 = vcmask 1046528   ;;  %vm941_vm4 = vcmask 1044480  }
  0x77   : > { %v1852_v22 = vld [vmem:[%s2830_s12 + $0x408] sm:$0xff]  ;;  %v2056_v23 = vpack.c.bf16 %v1790_v21, %v1788_v20  ;;  %v1854_v24 = vld [vmem:[%s2830_s12 + $0x418] sm:$0xff]  ;;  %v1789_v26 = vld [vmem:[%s2830_s12 + $0x210] sm:$0xff]  ;;  %vm1148_vm5 = vcmask 1043456   ;;  %vm1387_vm6 = vcmask 1040384   ;;  %vm1481_vm7 = vcmask 130048  }
  0x78   : > { %v2184_v27 = vpack.c.bf16 %v1854_v24, %v1852_v22  ;;  %v2058_v28 = vpack.c.bf16 %v1789_v26, %v1787_v25  ;;  %v1851_v29 = vld [vmem:[%s2830_s12 + $0x400] sm:$0xff]  ;;  %v1853_v30 = vld [vmem:[%s2830_s12 + $0x410] sm:$0xff]  ;;  %v1792_v31 = vld [vmem:[%s2830_s12 + $0x228] sm:$0xff]  ;;  %p2044_p9 = scmp.ge.s32.totalorder %s2694_s19, 9 }
  0x79   : > { %2057 = vmatprep.subr.bf16.mxu1 %v2056_v23  ;;  %v2186_v32 = vpack.c.bf16 %v1853_v30, %v1851_v29  ;;  %v1794_v33 = vld [vmem:[%s2830_s12 + $0x238] sm:$0xff]  ;;  %v1856_v34 = vld [vmem:[%s2830_s12 + $0x428] sm:$0xff]  ;;  %v1791_v38 = vld [vmem:[%s2830_s12 + $0x220] sm:$0xff]  ;;  %vm1608_vm8 = vcmask (!%p2044_p9), 1041408  }
  0x7a   : > { %v1858_v35 = vld [vmem:[%s2830_s12 + $0x438] sm:$0xff]  ;;  %2185 = vmatprep.subr.bf16.mxu0 %v2184_v27  ;;  %2059 = vmatpush1.bf16.msra.mxu1 %v2058_v28  ;;  %v2060_v36 = vpack.c.bf16 %v1794_v33, %v1792_v31  ;;  %v1793_v39 = vld [vmem:[%s2830_s12 + $0x230] sm:$0xff]  ;;  %v1855_v40 = vld [vmem:[%s2830_s12 + $0x420] sm:$0xff] }
  0x7b   : > { %v2188_v37 = vpack.c.bf16 %v1858_v35, %v1856_v34  ;;  %2187 = vmatpush1.bf16.msra.mxu0 %v2186_v32  ;;  %v2062_v41 = vpack.c.bf16 %v1793_v39, %v1791_v38  ;;  %v1857_v42 = vld [vmem:[%s2830_s12 + $0x430] sm:$0xff]  ;;  %v1796_v43 = vld [vmem:[%s2830_s12 + $0x248] sm:$0xff]  ;;  %v1798_v44 = vld [vmem:[%s2830_s12 + $0x258] sm:$0xff] }
  0x7c   : > { %2061 = vmatprep.subr.bf16.mxu1 %v2060_v36  ;;  %v2190_v45 = vpack.c.bf16 %v1857_v42, %v1855_v40  ;;  %v2064_v46 = vpack.c.bf16 %v1798_v44, %v1796_v43  ;;  %v1860_v47 = vld [vmem:[%s2830_s12 + $0x448] sm:$0xff]  ;;  %v1862_v48 = vld [vmem:[%s2830_s12 + $0x458] sm:$0xff]  ;;  %v1795_v49 = vld [vmem:[%s2830_s12 + $0x240] sm:$0xff] }
  0x7d   : > { %2189 = vmatprep.subr.bf16.mxu0 %v2188_v37  ;;  %v2192_v50 = vpack.c.bf16 %v1862_v48, %v1860_v47  ;;  %v1797_v51 = vld [vmem:[%s2830_s12 + $0x250] sm:$0xff]  ;;  %v1859_v52 = vld [vmem:[%s2830_s12 + $0x440] sm:$0xff]  ;;  %v1800_v55 = vld [vmem:[%s2830_s12 + $0x268] sm:$0xff] }
  0x7e   : > { %v1861_v53 = vld [vmem:[%s2830_s12 + $0x450] sm:$0xff]  ;;  %2063 = vmatpush1.bf16.msra.mxu1 %v2062_v41  ;;  %v2066_v54 = vpack.c.bf16 %v1797_v51, %v1795_v49  ;;  %v1802_v56 = vld [vmem:[%s2830_s12 + $0x278] sm:$0xff]  ;;  %v1864_v57 = vld [vmem:[%s2830_s12 + $0x468] sm:$0xff] }
  0x7f   : > { %2191 = vmatpush1.bf16.msra.mxu0 %v2190_v45  ;;  %2065 = vmatprep.subr.bf16.mxu1 %v2064_v46  ;;  %v2194_v58 = vpack.c.bf16 %v1861_v53, %v1859_v52  ;;  %v2068_v59 = vpack.c.bf16 %v1802_v56, %v1800_v55  ;;  %v1866_v60 = vld [vmem:[%s2830_s12 + $0x478] sm:$0xff]  ;;  %v1799_v61 = vld [vmem:[%s2830_s12 + $0x260] sm:$0xff]  ;;  %v1801_v62 = vld [vmem:[%s2830_s12 + $0x270] sm:$0xff] }
  0x80   : > { %2193 = vmatprep.subr.bf16.mxu0 %v2192_v50  ;;  %v2196_v63 = vpack.c.bf16 %v1866_v60, %v1864_v57  ;;  %v1863_v0 = vld [vmem:[%s2830_s12 + $0x460] sm:$0xff]  ;;  %v1865_v1 = vld [vmem:[%s2830_s12 + $0x470] sm:$0xff]  ;;  %v1804_v2 = vld [vmem:[%s2830_s12 + $0x288] sm:$0xff]  ;;  %v2070_v6 = vpack.c.bf16 %v1801_v62, %v1799_v61 }
  0x81   : > { %v1806_v3 = vld [vmem:[%s2830_s12 + $0x298] sm:$0xff]  ;;  %v1868_v4 = vld [vmem:[%s2830_s12 + $0x488] sm:$0xff]  ;;  %v2198_v7 = vpack.c.bf16 %v1865_v1, %v1863_v0  ;;  %v1803_v9 = vld [vmem:[%s2830_s12 + $0x280] sm:$0xff] }
  0x82   : > { %v1870_v5 = vld [vmem:[%s2830_s12 + $0x498] sm:$0xff]  ;;  %2067 = vmatpush1.bf16.msra.mxu1 %v2066_v54  ;;  %v2072_v8 = vpack.c.bf16 %v1806_v3, %v1804_v2  ;;  %v1805_v10 = vld [vmem:[%s2830_s12 + $0x290] sm:$0xff]  ;;  %v1867_v11 = vld [vmem:[%s2830_s12 + $0x480] sm:$0xff] }
  0x83   : > { %2195 = vmatpush1.bf16.msra.mxu0 %v2194_v58  ;;  %2069 = vmatprep.subr.bf16.mxu1 %v2068_v59  ;;  %v2200_v12 = vpack.c.bf16 %v1870_v5, %v1868_v4  ;;  %v1869_v13 = vld [vmem:[%s2830_s12 + $0x490] sm:$0xff]  ;;  %v1808_v14 = vld [vmem:[%s2830_s12 + $0x2a8] sm:$0xff]  ;;  %v1810_v15 = vld [vmem:[%s2830_s12 + $0x2b8] sm:$0xff]  ;;  %v2074_v18 = vpack.c.bf16 %v1805_v10, %v1803_v9 }
  0x84   : > { %2197 = vmatprep.subr.bf16.mxu0 %v2196_v63  ;;  %v1872_v16 = vld [vmem:[%s2830_s12 + $0x4a8] sm:$0xff]  ;;  %v1874_v17 = vld [vmem:[%s2830_s12 + $0x4b8] sm:$0xff]  ;;  %v2202_v19 = vpack.c.bf16 %v1869_v13, %v1867_v11  ;;  %v2076_v20 = vpack.c.bf16 %v1810_v15, %v1808_v14  ;;  %v1807_v21 = vld [vmem:[%s2830_s12 + $0x2a0] sm:$0xff]  ;;  %v315_v15 = vlaneseq }
  0x85   : > { %v1809_v22 = vld [vmem:[%s2830_s12 + $0x2b0] sm:$0xff]  ;;  %v1871_v23 = vld [vmem:[%s2830_s12 + $0x4a0] sm:$0xff]  ;;  %v2204_v24 = vpack.c.bf16 %v1874_v17, %v1872_v16  ;;  %v1812_v26 = vld [vmem:[%s2830_s12 + $0x2c8] sm:$0xff] }
  0x86   : > { %2071 = vmatpush1.bf16.msra.mxu1 %v2070_v6  ;;  %v1873_v25 = vld [vmem:[%s2830_s12 + $0x4b0] sm:$0xff]  ;;  %v1814_v27 = vld [vmem:[%s2830_s12 + $0x2d8] sm:$0xff]  ;;  %v1876_v28 = vld [vmem:[%s2830_s12 + $0x4c8] sm:$0xff]  ;;  %v2078_v30 = vpack.c.bf16 %v1809_v22, %v1807_v21  ;;  %vm2971_vm1 = vcmp.lt.s32.totalorder %v315_v15, 256 }
  0x87   : > { %2199 = vmatpush1.bf16.msra.mxu0 %v2198_v7  ;;  %2073 = vmatprep.subr.bf16.mxu1 %v2072_v8  ;;  %v1878_v29 = vld [vmem:[%s2830_s12 + $0x4d8] sm:$0xff]  ;;  %v2206_v31 = vpack.c.bf16 %v1873_v25, %v1871_v23  ;;  %v2080_v32 = vpack.c.bf16 %v1814_v27, %v1812_v26  ;;  %v1811_v33 = vld [vmem:[%s2830_s12 + $0x2c0] sm:$0xff]  ;;  %v1813_v34 = vld [vmem:[%s2830_s12 + $0x2d0] sm:$0xff] }
  0x88   : > { %2201 = vmatprep.subr.bf16.mxu0 %v2200_v12  ;;  %v1875_v35 = vld [vmem:[%s2830_s12 + $0x4c0] sm:$0xff]  ;;  %v2208_v36 = vpack.c.bf16 %v1878_v29, %v1876_v28  ;;  %v1877_v37 = vld [vmem:[%s2830_s12 + $0x4d0] sm:$0xff]  ;;  %v1816_v38 = vld [vmem:[%s2830_s12 + $0x2e8] sm:$0xff]  ;;  %v2082_v42 = vpack.c.bf16 %v1813_v34, %v1811_v33 }
  0x89   : > { %v1818_v39 = vld [vmem:[%s2830_s12 + $0x2f8] sm:$0xff]  ;;  %v1880_v40 = vld [vmem:[%s2830_s12 + $0x4e8] sm:$0xff]  ;;  %v2210_v43 = vpack.c.bf16 %v1877_v37, %v1875_v35  ;;  %v1815_v45 = vld [vmem:[%s2830_s12 + $0x2e0] sm:$0xff] }
  0x8a   : > { %2075 = vmatpush1.bf16.msra.mxu1 %v2074_v18  ;;  %v1882_v41 = vld [vmem:[%s2830_s12 + $0x4f8] sm:$0xff]  ;;  %v2084_v44 = vpack.c.bf16 %v1818_v39, %v1816_v38  ;;  %v1817_v46 = vld [vmem:[%s2830_s12 + $0x2f0] sm:$0xff]  ;;  %v1879_v47 = vld [vmem:[%s2830_s12 + $0x4e0] sm:$0xff] }
  0x8b   : > { %2203 = vmatpush1.bf16.msra.mxu0 %v2202_v19  ;;  %2077 = vmatprep.subr.bf16.mxu1 %v2076_v20  ;;  %v2212_v48 = vpack.c.bf16 %v1882_v41, %v1880_v40  ;;  %v1881_v49 = vld [vmem:[%s2830_s12 + $0x4f0] sm:$0xff]  ;;  %v1820_v50 = vld [vmem:[%s2830_s12 + $0x308] sm:$0xff]  ;;  %v1822_v51 = vld [vmem:[%s2830_s12 + $0x318] sm:$0xff]  ;;  %v2086_v54 = vpack.c.bf16 %v1817_v46, %v1815_v45 }
  0x8c   : > { %2205 = vmatprep.subr.bf16.mxu0 %v2204_v24  ;;  %v1884_v52 = vld [vmem:[%s2830_s12 + $0x508] sm:$0xff]  ;;  %v1886_v53 = vld [vmem:[%s2830_s12 + $0x518] sm:$0xff]  ;;  %v2214_v55 = vpack.c.bf16 %v1881_v49, %v1879_v47  ;;  %v2088_v56 = vpack.c.bf16 %v1822_v51, %v1820_v50  ;;  %v1819_v57 = vld [vmem:[%s2830_s12 + $0x300] sm:$0xff] }
  0x8d   : > { %v1821_v58 = vld [vmem:[%s2830_s12 + $0x310] sm:$0xff]  ;;  %v1883_v59 = vld [vmem:[%s2830_s12 + $0x500] sm:$0xff]  ;;  %v2216_v60 = vpack.c.bf16 %v1886_v53, %v1884_v52  ;;  %v1824_v62 = vld [vmem:[%s2830_s12 + $0x328] sm:$0xff] }
  0x8e   : > { %2079 = vmatpush1.bf16.msra.mxu1 %v2078_v30  ;;  %v1885_v61 = vld [vmem:[%s2830_s12 + $0x510] sm:$0xff]  ;;  %v1826_v63 = vld [vmem:[%s2830_s12 + $0x338] sm:$0xff]  ;;  %v1888_v0 = vld [vmem:[%s2830_s12 + $0x528] sm:$0xff]  ;;  %v2090_v2 = vpack.c.bf16 %v1821_v58, %v1819_v57 }
  0x8f   : > { %2207 = vmatpush1.bf16.msra.mxu0 %v2206_v31  ;;  %2081 = vmatprep.subr.bf16.mxu1 %v2080_v32  ;;  %v1890_v1 = vld [vmem:[%s2830_s12 + $0x538] sm:$0xff]  ;;  %v2218_v3 = vpack.c.bf16 %v1885_v61, %v1883_v59  ;;  %v2092_v4 = vpack.c.bf16 %v1826_v63, %v1824_v62  ;;  %v1823_v5 = vld [vmem:[%s2830_s12 + $0x320] sm:$0xff]  ;;  %v1825_v6 = vld [vmem:[%s2830_s12 + $0x330] sm:$0xff] }
  0x90   : > { %2209 = vmatprep.subr.bf16.mxu0 %v2208_v36  ;;  %v1887_v7 = vld [vmem:[%s2830_s12 + $0x520] sm:$0xff]  ;;  %v2220_v8 = vpack.c.bf16 %v1890_v1, %v1888_v0  ;;  %v1889_v9 = vld [vmem:[%s2830_s12 + $0x530] sm:$0xff]  ;;  %v1828_v10 = vld [vmem:[%s2830_s12 + $0x348] sm:$0xff]  ;;  %v2094_v14 = vpack.c.bf16 %v1825_v6, %v1823_v5 }
  0x91   : > { %v1830_v11 = vld [vmem:[%s2830_s12 + $0x358] sm:$0xff]  ;;  %v1892_v12 = vld [vmem:[%s2830_s12 + $0x548] sm:$0xff]  ;;  %v2222_v16 = vpack.c.bf16 %v1889_v9, %v1887_v7  ;;  %v1827_v18 = vld [vmem:[%s2830_s12 + $0x340] sm:$0xff] }
  0x92   : > { %2083 = vmatpush1.bf16.msra.mxu1 %v2082_v42  ;;  %v1894_v13 = vld [vmem:[%s2830_s12 + $0x558] sm:$0xff]  ;;  %v2096_v17 = vpack.c.bf16 %v1830_v11, %v1828_v10  ;;  %v1829_v19 = vld [vmem:[%s2830_s12 + $0x350] sm:$0xff]  ;;  %v1891_v20 = vld [vmem:[%s2830_s12 + $0x540] sm:$0xff] }
  0x93   : > { %2211 = vmatpush1.bf16.msra.mxu0 %v2210_v43  ;;  %2085 = vmatprep.subr.bf16.mxu1 %v2084_v44  ;;  %v2224_v21 = vpack.c.bf16 %v1894_v13, %v1892_v12  ;;  %v1893_v22 = vld [vmem:[%s2830_s12 + $0x550] sm:$0xff]  ;;  %v1832_v23 = vld [vmem:[%s2830_s12 + $0x368] sm:$0xff]  ;;  %v1834_v24 = vld [vmem:[%s2830_s12 + $0x378] sm:$0xff]  ;;  %v2098_v27 = vpack.c.bf16 %v1829_v19, %v1827_v18 }
  0x94   : > { %2213 = vmatprep.subr.bf16.mxu0 %v2212_v48  ;;  %v1896_v25 = vld [vmem:[%s2830_s12 + $0x568] sm:$0xff]  ;;  %v1898_v26 = vld [vmem:[%s2830_s12 + $0x578] sm:$0xff]  ;;  %v1831_v28 = vld [vmem:[%s2830_s12 + $0x360] sm:$0xff]  ;;  %v2226_v30 = vpack.c.bf16 %v1893_v22, %v1891_v20  ;;  %v2100_v31 = vpack.c.bf16 %v1834_v24, %v1832_v23 }
  0x95   : > { %v1833_v32 = vld [vmem:[%s2830_s12 + $0x370] sm:$0xff]  ;;  %v1895_v33 = vld [vmem:[%s2830_s12 + $0x560] sm:$0xff]  ;;  %v2228_v35 = vpack.c.bf16 %v1898_v26, %v1896_v25  ;;  %v1836_v36 = vld [vmem:[%s2830_s12 + $0x388] sm:$0xff] }
  0x96   : > { %2087 = vmatpush1.bf16.msra.mxu1 %v2086_v54  ;;  %v1897_v34 = vld [vmem:[%s2830_s12 + $0x570] sm:$0xff]  ;;  %v1838_v37 = vld [vmem:[%s2830_s12 + $0x398] sm:$0xff]  ;;  %v325_v38 = vld [vmem:[#allocation2 + $0x3] ss:$8 sm:$0x3]  ;;  %v2102_v42 = vpack.c.bf16 %v1833_v32, %v1831_v28 }
  0x97   : > { %2215 = vmatpush1.bf16.msra.mxu0 %v2214_v55  ;;  %2089 = vmatprep.subr.bf16.mxu1 %v2088_v56  ;;  %v1900_v39 = vld [vmem:[%s2830_s12 + $0x588] sm:$0xff]  ;;  %v1902_v40 = vld [vmem:[%s2830_s12 + $0x598] sm:$0xff]  ;;  %329 = vst.msk [vmem:[#allocation2 + $0x1] ss:$8 sm:$0x3] %vm2971_vm1, %v325_v38  ;;  %v2230_v45 = vpack.c.bf16 %v1897_v34, %v1895_v33  ;;  %v2104_v46 = vpack.c.bf16 %v1838_v37, %v1836_v36  ;;  %v1835_v47 = vld [vmem:[%s2830_s12 + $0x380] sm:$0xff] }
  0x98   : > { %2217 = vmatprep.subr.bf16.mxu0 %v2216_v60  ;;  %v2984_v41 = vld [vmem:[#allocation2 + $0x18] sm:$0xff]  ;;  %v719_v43 = vld [vmem:[#allocation2 + $0x8] sm:$0xfc]  ;;  %v1837_v48 = vld [vmem:[%s2830_s12 + $0x390] sm:$0xff]  ;;  %v2232_v51 = vpack.c.bf16 %v1902_v40, %v1900_v39 }
  0x99   : > { %v739_v44 = vrot.slane %v2984_v41, 2  ;;  %v1899_v49 = vld [vmem:[%s2830_s12 + $0x580] sm:$0xff]  ;;  %v738_v50 = vrot.slane %v719_v43, 2  ;;  %v1901_v52 = vld [vmem:[%s2830_s12 + $0x590] sm:$0xff]  ;;  %v1840_v53 = vld [vmem:[%s2830_s12 + $0x3a8] sm:$0xff]  ;;  %v2106_v58 = vpack.c.bf16 %v1837_v48, %v1835_v47  ;;  %v451_v1 = vrot.slane %v2984_v41, 1 }
  0x9a   : > { %2091 = vmatpush1.bf16.msra.mxu1 %v2090_v2  ;;  %v1842_v54 = vld [vmem:[%s2830_s12 + $0x3b8] sm:$0xff]  ;;  %v1904_v55 = vld [vmem:[%s2830_s12 + $0x5a8] sm:$0xff]  ;;  %v1839_v59 = vld [vmem:[%s2830_s12 + $0x3a0] sm:$0xff]  ;;  %v2234_v60 = vpack.c.bf16 %v1901_v52, %v1899_v49 }
  0x9b   : > { %2219 = vmatpush1.bf16.msra.mxu0 %v2218_v3  ;;  %2093 = vmatprep.subr.bf16.mxu1 %v2092_v4  ;;  %v1906_v56 = vld [vmem:[%s2830_s12 + $0x5b8] sm:$0xff]  ;;  %v740_v57 = vsel %vm734_vm2, %v738_v50, %v739_v44  ;;  %v2108_v61 = vpack.c.bf16 %v1842_v54, %v1840_v53  ;;  %v1841_v62 = vld [vmem:[%s2830_s12 + $0x3b0] sm:$0xff]  ;;  %v1903_v63 = vld [vmem:[%s2830_s12 + $0x5a0] sm:$0xff] }
  0x9c   : > { %2221 = vmatprep.subr.bf16.mxu0 %v2220_v8  ;;  %892 = vmatprep.mubr.f32.mxu0 %v740_v57  ;;  %v1905_v0 = vld [vmem:[%s2830_s12 + $0x5b0] sm:$0xff]  ;;  %v2236_v2 = vpack.c.bf16 %v1906_v56, %v1904_v55  ;;  %v1844_v3 = vld [vmem:[%s2830_s12 + $0x3c8] sm:$0xff]  ;;  %v1846_v4 = vld [vmem:[%s2830_s12 + $0x3d8] sm:$0xff]  ;;  %v2110_v9 = vpack.c.bf16 %v1841_v62, %v1839_v59 }
  0x9d   : > { %v1908_v6 = vld [vmem:[%s2830_s12 + $0x5c8] sm:$0xff]  ;;  %v1910_v7 = vld [vmem:[%s2830_s12 + $0x5d8] sm:$0xff]  ;;  %v2238_v10 = vpack.c.bf16 %v1905_v0, %v1903_v63  ;;  %v2112_v11 = vpack.c.bf16 %v1846_v4, %v1844_v3  ;;  %v1843_v12 = vld [vmem:[%s2830_s12 + $0x3c0] sm:$0xff] }
  0x9e   : > { %2095 = vmatpush1.bf16.msra.mxu1 %v2094_v14  ;;  %v427_v5 = vld [vmem:[#allocation2 + $0x8] sm:$0xfe]  ;;  %v1845_v13 = vld [vmem:[%s2830_s12 + $0x3d0] sm:$0xff]  ;;  %v1907_v14 = vld [vmem:[%s2830_s12 + $0x5c0] sm:$0xff] }
  0x9f   : > { %2223 = vmatpush1.bf16.msra.mxu0 %v2222_v16  ;;  %2097 = vmatprep.subr.bf16.mxu1 %v2096_v17  ;;  %v450_v8 = vrot.slane %v427_v5, 1  ;;  %v2240_v17 = vpack.c.bf16 %v1910_v7, %v1908_v6  ;;  %v1909_v18 = vld [vmem:[%s2830_s12 + $0x5d0] sm:$0xff]  ;;  %v1848_v19 = vld [vmem:[%s2830_s12 + $0x3e8] sm:$0xff]  ;;  %v1850_v20 = vld [vmem:[%s2830_s12 + $0x3f8] sm:$0xff]  ;;  %v2114_v23 = vpack.c.bf16 %v1845_v13, %v1843_v12 }
  0xa0   : > { %2225 = vmatprep.subr.bf16.mxu0 %v2224_v21  ;;  %v1912_v21 = vld [vmem:[%s2830_s12 + $0x5e8] sm:$0xff]  ;;  %v1914_v22 = vld [vmem:[%s2830_s12 + $0x5f8] sm:$0xff]  ;;  %v1847_v24 = vld [vmem:[%s2830_s12 + $0x3e0] sm:$0xff]  ;;  %v2116_v28 = vpack.c.bf16 %v1850_v20, %v1848_v19 }
  0xa1   : > { %v452_v16 = vsel %vm446_vm3, %v450_v8, %v451_v1  ;;  %v1849_v25 = vld [vmem:[%s2830_s12 + $0x3f0] sm:$0xff]  ;;  %v1911_v26 = vld [vmem:[%s2830_s12 + $0x5e0] sm:$0xff]  ;;  %v2244_v33 = vpack.c.bf16 %v1914_v22, %v1912_v21  ;;  %v363_v34 = vld [vmem:[%s2830_s12 + $0x8] sm:$0xff] }
  0xa2   : > { %2099 = vmatpush1.bf16.msra.mxu1 %v2098_v27  ;;  %604 = vmatprep.mubr.f32.mxu1 %v452_v16  ;;  %v2242_v27 = vpack.c.bf16 %v1909_v18, %v1907_v14  ;;  %v426_v32 = vld [vmem:[#allocation2] sm:$0xfe]  ;;  %v1916_v37 = vld [vmem:[%s2830_s12 + $0x608] sm:$0xff]  ;;  %v1918_v38 = vld [vmem:[%s2830_s12 + $0x618] sm:$0xff]  ;;  %v2118_v39 = vpack.c.bf16 %v1849_v25, %v1847_v24 }
  0xa3   : > { %2227 = vmatpush1.bf16.msra.mxu0 %v2226_v30  ;;  %2101 = vmatprep.subr.bf16.mxu1 %v2100_v31  ;;  %v1913_v30 = vld [vmem:[%s2830_s12 + $0x5f0] sm:$0xff]  ;;  %v718_v36 = vld [vmem:[#allocation2] sm:$0xfc]  ;;  %v447_v40 = vrot.slane %v426_v32, 1  ;;  %v367_v53 = vld [vmem:[%s2830_s12 + $0x28] sm:$0xff] }
  0xa4   : > { %2229 = vmatprep.subr.bf16.mxu0 %v2228_v35  ;;  %v3022_v31 = vld [vmem:[#allocation2 + $0x10] sm:$0xff]  ;;  %v365_v35 = vld [vmem:[%s2830_s12 + $0x18] sm:$0xff]  ;;  %v2246_v43 = vpack.c.bf16 %v1913_v30, %v1911_v26  ;;  %v735_v48 = vrot.slane %v718_v36, 2  ;;  %v1915_v50 = vld [vmem:[%s2830_s12 + $0x600] sm:$0xff] }
  0xa5   : > { %v364_v47 = vld [vmem:[%s2830_s12 + $0x10] sm:$0xff]  ;;  %v736_v49 = vrot.slane %v3022_v31, 2  ;;  %v369_v54 = vld [vmem:[%s2830_s12 + $0x38] sm:$0xff]  ;;  %v1920_v55 = vld [vmem:[%s2830_s12 + $0x628] sm:$0xff] }
  0xa6   : > { %2103 = vmatpush1.bf16.msra.mxu1 %v2102_v42  ;;  %v448_v42 = vrot.slane %v3022_v31, 1  ;;  %v1917_v52 = vld [vmem:[%s2830_s12 + $0x610] sm:$0xff]  ;;  %v1922_v56 = vld [vmem:[%s2830_s12 + $0x638] sm:$0xff]  ;;  %v366_v62 = vld [vmem:[%s2830_s12 + $0x20] sm:$0xff] }
  0xa7   : > { %2231 = vmatpush1.bf16.msra.mxu0 %v2230_v45  ;;  %2105 = vmatprep.subr.bf16.mxu1 %v2104_v46  ;;  %v2120_v45 = vpack.c.bf16 %v365_v35, %v363_v34  ;;  %v362_v46 = vld [vmem:[%s2830_s12] sm:$0xff]  ;;  %v737_v59 = vsel %vm734_vm2, %v735_v48, %v736_v49  ;;  %v368_v63 = vld [vmem:[%s2830_s12 + $0x30] sm:$0xff]  ;;  %v371_v4 = vld [vmem:[%s2830_s12 + $0x48] sm:$0xff] }
  0xa8   : > { %2233 = vmatprep.subr.bf16.mxu0 %v2232_v51  ;;  %v2248_v51 = vpack.c.bf16 %v1918_v38, %v1916_v37  ;;  %v449_v57 = vsel %vm446_vm3, %v447_v40, %v448_v42  ;;  %v1919_v0 = vld [vmem:[%s2830_s12 + $0x620] sm:$0xff]  ;;  %v1921_v3 = vld [vmem:[%s2830_s12 + $0x630] sm:$0xff]  ;;  %v373_v5 = vld [vmem:[%s2830_s12 + $0x58] sm:$0xff]  ;;  %v2126_v8 = vpack.c.bf16 %v368_v63, %v366_v62 }
  0xa9   : > { %v1924_v6 = vld [vmem:[%s2830_s12 + $0x648] sm:$0xff]  ;;  %v1926_v7 = vld [vmem:[%s2830_s12 + $0x658] sm:$0xff]  ;;  %v372_v12 = vld [vmem:[%s2830_s12 + $0x50] sm:$0xff] }
  0xaa   : > { %2107 = vmatpush1.bf16.msra.mxu1 %v2106_v58  ;;  %v2122_v58 = vpack.c.bf16 %v364_v47, %v362_v46  ;;  %v1923_v13 = vld [vmem:[%s2830_s12 + $0x640] sm:$0xff]  ;;  %v2256_v14 = vpack.c.bf16 %v1926_v7, %v1924_v6  ;;  %v1925_v16 = vld [vmem:[%s2830_s12 + $0x650] sm:$0xff]  ;;  %v377_v18 = vld [vmem:[%s2830_s12 + $0x78] sm:$0xff] }
  0xab   : > { %2235 = vmatpush1.bf16.msra.mxu0 %v2234_v60  ;;  %2109 = vmatprep.subr.bf16.mxu1 %v2108_v61  ;;  %v2250_v60 = vpack.c.bf16 %v1917_v52, %v1915_v50  ;;  %v2124_v61 = vpack.c.bf16 %v369_v54, %v367_v53  ;;  %v1928_v19 = vld [vmem:[%s2830_s12 + $0x668] sm:$0xff]  ;;  %v1930_v20 = vld [vmem:[%s2830_s12 + $0x678] sm:$0xff]  ;;  %v2258_v22 = vpack.c.bf16 %v1925_v16, %v1923_v13  ;;  %v374_v24 = vld [vmem:[%s2830_s12 + $0x60] sm:$0xff] }
  0xac   : > { %2237 = vmatprep.subr.bf16.mxu0 %v2236_v2  ;;  %v2252_v2 = vpack.c.bf16 %v1922_v56, %v1920_v55  ;;  %v376_v25 = vld [vmem:[%s2830_s12 + $0x70] sm:$0xff]  ;;  %v1927_v26 = vld [vmem:[%s2830_s12 + $0x660] sm:$0xff]  ;;  %v379_v30 = vld [vmem:[%s2830_s12 + $0x88] sm:$0xff] }
  0xad   : > { %v381_v32 = vld [vmem:[%s2830_s12 + $0x98] sm:$0xff]  ;;  %v2134_v35 = vpack.c.bf16 %v376_v25, %v374_v24  ;;  %v378_v36 = vld [vmem:[%s2830_s12 + $0x80] sm:$0xff]  ;;  %v380_v37 = vld [vmem:[%s2830_s12 + $0x90] sm:$0xff] }
  0xae   : > { %2111 = vmatpush1.bf16.msra.mxu1 %v2110_v9  ;;  %v2254_v9 = vpack.c.bf16 %v1921_v3, %v1919_v0  ;;  %v1934_v34 = vld [vmem:[%s2830_s12 + $0x698] sm:$0xff]  ;;  %v1931_v40 = vld [vmem:[%s2830_s12 + $0x680] sm:$0xff]  ;;  %v1936_v48 = vld [vmem:[%s2830_s12 + $0x6a8] sm:$0xff]  ;;  %v2138_v54 = vpack.c.bf16 %v380_v37, %v378_v36 }
  0xaf   : > { %2239 = vmatpush1.bf16.msra.mxu0 %v2238_v10  ;;  %2113 = vmatprep.subr.bf16.mxu1 %v2112_v11  ;;  %v2128_v10 = vpack.c.bf16 %v373_v5, %v371_v4  ;;  %v370_v11 = vld [vmem:[%s2830_s12 + $0x40] sm:$0xff]  ;;  %v385_v47 = vld [vmem:[%s2830_s12 + $0xb8] sm:$0xff]  ;;  %v384_v52 = vld [vmem:[%s2830_s12 + $0xb0] sm:$0xff] }
  0xb0   : > { %2241 = vmatprep.subr.bf16.mxu0 %v2240_v17  ;;  %v375_v17 = vld [vmem:[%s2830_s12 + $0x68] sm:$0xff]  ;;  %v2130_v21 = vpack.c.bf16 %v372_v12, %v370_v11  ;;  %v1938_v50 = vld [vmem:[%s2830_s12 + $0x6b8] sm:$0xff]  ;;  %v1935_v55 = vld [vmem:[%s2830_s12 + $0x6a0] sm:$0xff] }
  0xb1   : > { %v429_v53 = vld [vmem:[#allocation2 + $0x28] sm:$0x1]  ;;  %v1937_v56 = vld [vmem:[%s2830_s12 + $0x6b0] sm:$0xff]  ;;  %v389_v62 = vld [vmem:[%s2830_s12 + $0xd8] sm:$0xff] }
  0xb2   : > { %2115 = vmatpush1.bf16.msra.mxu1 %v2114_v23  ;;  %v2132_v23 = vpack.c.bf16 %v377_v18, %v375_v17  ;;  %v721_v0 = vld [vmem:[#allocation2 + $0x28] sm:$0x3]  ;;  %v1942_v4 = vld [vmem:[%s2830_s12 + $0x6d8] sm:$0xff]  ;;  %v720_v7 = vld [vmem:[#allocation2 + $0x20] sm:$0x3] }
  0xb3   : > { %2243 = vmatpush1.bf16.msra.mxu0 %v2242_v27  ;;  %2117 = vmatprep.subr.bf16.mxu1 %v2116_v28  ;;  %v2260_v27 = vpack.c.bf16 %v1930_v20, %v1928_v19  ;;  %v1929_v28 = vld [vmem:[%s2830_s12 + $0x670] sm:$0xff]  ;;  %v1940_v3 = vld [vmem:[%s2830_s12 + $0x6c8] sm:$0xff]  ;;  %v743_v6 = vrot.slane %v721_v0, 2  ;;  %v741_v11 = vrot.slane %v720_v7, 2  ;;  %v3106_v17 = vld [vmem:[#allocation2 + $0x40] sm:$0xff] }
  0xb4   : > { %2245 = vmatprep.subr.bf16.mxu0 %v2244_v33  ;;  %v1932_v33 = vld [vmem:[%s2830_s12 + $0x688] sm:$0xff]  ;;  %v2262_v38 = vpack.c.bf16 %v1929_v28, %v1927_v26  ;;  %v327_v12 = vld [vmem:[#allocation2 + $0x33] ss:$8 sm:$0x3]  ;;  %v746_v28 = vrot.slane %v3106_v17, 2 }
  0xb5   : > { %v2264_v46 = vpack.c.bf16 %v1934_v34, %v1932_v33  ;;  %332 = vst.msk [vmem:[#allocation2 + $0x31] ss:$8 sm:$0x3] %vm2971_vm1, %v327_v12  ;;  %v3104_v16 = vld [vmem:[#allocation2 + $0x48] sm:$0xff]  ;;  %v1941_v19 = vld [vmem:[%s2830_s12 + $0x6d0] sm:$0xff]  ;;  %v393_v24 = vld [vmem:[%s2830_s12 + $0xf8] sm:$0xff] }
  0xb6   : > { %2119 = vmatpush1.bf16.msra.mxu1 %v2118_v39  ;;  %v2136_v39 = vpack.c.bf16 %v381_v32, %v379_v30  ;;  %v391_v20 = vld [vmem:[%s2830_s12 + $0xe8] sm:$0xff]  ;;  %v1946_v26 = vld [vmem:[%s2830_s12 + $0x6f8] sm:$0xff]  ;;  %v3119_v30 = vld [vmem:[%s2830_s12 + $0xe0] sm:$0xff] }
  0xb7   : > { %2247 = vmatpush1.bf16.msra.mxu0 %v2246_v43  ;;  %2121 = vmatprep.subr.bf16.mxu1 %v2120_v45  ;;  %v1933_v43 = vld [vmem:[%s2830_s12 + $0x690] sm:$0xff]  ;;  %v383_v45 = vld [vmem:[%s2830_s12 + $0xa8] sm:$0xff]  ;;  %v3125_v34 = vld [vmem:[%s2830_s12 + $0x6e0] sm:$0xff] }
  0xb8   : > { %2249 = vmatprep.subr.bf16.mxu0 %v2248_v51  ;;  %v382_v51 = vld [vmem:[%s2830_s12 + $0xa0] sm:$0xff]  ;;  %v1944_v25 = vld [vmem:[%s2830_s12 + $0x6e8] sm:$0xff]  ;;  %v392_v33 = vld [vmem:[%s2830_s12 + $0xf0] sm:$0xff] }
  0xb9   : > { %605 = vmatmul.mubr.f32.vlgmr.msra.gmra.mrb[0].mxu1 %v449_v57  ;;  %v455_v57 = vrot.slane %v429_v53, 1  ;;  %v2142_v13 = vpack.c.bf16 %v384_v52, %v382_v51  ;;  %v1950_v51 = vld [vmem:[%s2830_s12 + $0x718] sm:$0xff]  ;;  %v461_v52 = vrot.slane %v3104_v16, 1  ;;  %v458_v53 = vrot.slane %v3106_v17, 1  ;;  %v399_v12 = vld [vmem:[%s2830_s12 + $0x128] sm:$0xff]  ;;  %v1981_v29 = vld [vmem:[%s2830_s12 + $0x810] sm:$0xff] }
  0xba   : > { %2123 = vmatpush1.bf16.msra.mxu1 %v2122_v58  ;;  %893 = vmatmul.mubr.f32.vlgmr.msra.gmra.mrb[0].mxu0 %v737_v59  ;;  %v428_v58 = vld [vmem:[#allocation2 + $0x20] sm:$0x1]  ;;  %v2266_v59 = vpack.c.bf16 %v1933_v43, %v1931_v40  ;;  %v2276_v40 = vpack.c.bf16 %v1946_v26, %v1944_v25  ;;  %v395_v43 = vld [vmem:[%s2830_s12 + $0x108] sm:$0xff] }
  0xbb   : > { %2251 = vmatpush1.bf16.msra.mxu0 %v2250_v60  ;;  %2125 = vmatprep.subr.bf16.mxu1 %v2124_v61  ;;  %v2140_v60 = vpack.c.bf16 %v385_v47, %v383_v45  ;;  %v387_v61 = vld [vmem:[%s2830_s12 + $0xc8] sm:$0xff]  ;;  %v453_v63 = vrot.slane %v428_v58, 1  ;;  %v456_v5 = vsel %vm446_vm3, %v451_v1, %v455_v57  ;;  %v744_v1 = vsel %vm734_vm2, %v739_v44, %v743_v6  ;;  %v433_v45 = vld [vmem:[#allocation2 + $0x58] sm:$0x1]  ;;  %v394_v57 = vld [vmem:[%s2830_s12 + $0x100] sm:$0xff] }
  0xbc   : > { %2253 = vmatprep.subr.bf16.mxu0 %v2252_v2  ;;  %v2268_v2 = vpack.c.bf16 %v1938_v50, %v1936_v48  ;;  %610 = vmatprep.mubr.f32.mxu1 %v456_v5  ;;  %v2144_v18 = vpack.c.bf16 %v389_v62, %v387_v61  ;;  %v742_v44 = vsel %vm734_vm2, %v736_v49, %v741_v11  ;;  %v722_v49 = vld [vmem:[#allocation2 + $0x30] sm:$0xfc]  ;;  %v946_v47 = vrot.slane %v2984_v41, 3  ;;  %v397_v48 = vld [vmem:[%s2830_s12 + $0x118] sm:$0xff]  ;;  %v1948_v50 = vld [vmem:[%s2830_s12 + $0x708] sm:$0xff] }
  0xbd   : > { %898 = vmatprep.mubr.f32.mxu0 %v744_v1  ;;  %v745_v37 = vrot.slane %v722_v49, 2  ;;  %v396_v58 = vld [vmem:[%s2830_s12 + $0x110] sm:$0xff]  ;;  %v1947_v62 = vld [vmem:[%s2830_s12 + $0x700] sm:$0xff]  ;;  %v2152_v6 = vpack.c.bf16 %v397_v48, %v395_v43 }
  0xbe   : > { %2127 = vmatpush1.bf16.msra.mxu1 %v2126_v8  ;;  %v3088_v8 = vld [vmem:[%s2830_s12 + $0xc0] sm:$0xff]  ;;  %899 = vmatmul.mubr.f32.gmra.mrb[2].mxu0 %v742_v44  ;;  %v432_v61 = vld [vmem:[#allocation2 + $0x50] sm:$0x1] }
  0xbf   : > { %2255 = vmatpush1.bf16.msra.mxu0 %v2254_v9  ;;  %2129 = vmatprep.subr.bf16.mxu1 %v2128_v10  ;;  %v3091_v9 = vld [vmem:[%s2830_s12 + $0xd0] sm:$0xff]  ;;  %v454_v10 = vsel %vm446_vm3, %v448_v42, %v453_v63  ;;  %v2270_v42 = vpack.c.bf16 %v1937_v56, %v1935_v55  ;;  %v2150_v56 = vpack.c.bf16 %v392_v33, %v3119_v30  ;;  %v398_v26 = vld [vmem:[%s2830_s12 + $0x120] sm:$0xff]  ;;  %v405_v33 = vld [vmem:[%s2830_s12 + $0x158] sm:$0xff] }
  0xc0   : > { %2257 = vmatprep.subr.bf16.mxu0 %v2256_v14  ;;  %v3097_v14 = vld [vmem:[%s2830_s12 + $0x6c0] sm:$0xff]  ;;  %611 = vmatmul.mubr.f32.gmra.mrb[2].mxu1 %v454_v10  ;;  %v2146_v32 = vpack.c.bf16 %v3091_v9, %v3088_v8  ;;  %v926_v9 = vld [vmem:[#allocation2 + $0x8] sm:$0xf8]  ;;  %v2280_v10 = vpack.c.bf16 %v1950_v51, %v1948_v50  ;;  %v1949_v11 = vld [vmem:[%s2830_s12 + $0x710] sm:$0xff] }
  0xc1   : > { %v312_v8 = vld [vmem:[#allocation2 + $0x4] ss:$8 sm:$0x3]  ;;  %v945_v1 = vrot.slane %v926_v9, 3  ;;  %v1953_v49 = vld [vmem:[%s2830_s12 + $0x730] sm:$0xff] }
  0xc2   : > { %2131 = vmatpush1.bf16.msra.mxu1 %v2130_v21  ;;  %v723_v21 = vld [vmem:[#allocation2 + $0x38] sm:$0xfc]  ;;  %319 = vst.msk [vmem:[#allocation2] ss:$8 sm:$0x3] %vm2971_vm1, %v312_v8  ;;  %v404_v43 = vld [vmem:[%s2830_s12 + $0x150] sm:$0xff] }
  0xc3   : > { %2259 = vmatpush1.bf16.msra.mxu0 %v2258_v22  ;;  %2133 = vmatprep.subr.bf16.mxu1 %v2132_v23  ;;  %v749_v22 = vrot.slane %v3104_v16, 2  ;;  %v2272_v23 = vpack.c.bf16 %v1942_v4, %v1940_v3  ;;  %v724_v4 = vld [vmem:[#allocation2 + $0x50] sm:$0x3]  ;;  %v407_v51 = vld [vmem:[%s2830_s12 + $0x168] sm:$0xff]  ;;  %v1963_v9 = vld [vmem:[%s2830_s12 + $0x780] sm:$0xff] }
  0xc4   : > { %2261 = vmatprep.subr.bf16.mxu0 %v2260_v27  ;;  %v748_v27 = vrot.slane %v723_v21, 2  ;;  %v751_v7 = vrot.slane %v724_v4, 2  ;;  %v2154_v21 = vpack.c.bf16 %v396_v58, %v394_v57  ;;  %v1957_v50 = vld [vmem:[%s2830_s12 + $0x750] sm:$0xff]  ;;  %v406_v58 = vld [vmem:[%s2830_s12 + $0x160] sm:$0xff] }
  0xc5   : > { %v412_v8 = vld [vmem:[%s2830_s12 + $0x190] sm:$0xff] }
  0xc6   : > { %2135 = vmatpush1.bf16.msra.mxu1 %v2134_v35  ;;  %v3128_v35 = vld [vmem:[%s2830_s12 + $0x6f0] sm:$0xff]  ;;  %v750_v36 = vsel %vm734_vm2, %v748_v27, %v749_v22  ;;  %v752_v44 = vsel %vm734_vm2, %v746_v28, %v751_v7  ;;  %v410_v7 = vld [vmem:[%s2830_s12 + $0x180] sm:$0xff] }
  0xc7   : > { %2263 = vmatpush1.bf16.msra.mxu0 %v2262_v38  ;;  %2137 = vmatprep.subr.bf16.mxu1 %v2136_v39  ;;  %v2274_v38 = vpack.c.bf16 %v1941_v19, %v3097_v14  ;;  %v2148_v39 = vpack.c.bf16 %v393_v24, %v391_v20  ;;  %v2278_v5 = vpack.c.bf16 %v3128_v35, %v3125_v34  ;;  %v463_v20 = vrot.slane %v432_v61, 1  ;;  %v400_v27 = vld [vmem:[%s2830_s12 + $0x130] sm:$0xff]  ;;  %v1956_v34 = vld [vmem:[%s2830_s12 + $0x748] sm:$0xff]  ;;  %v1958_v35 = vld [vmem:[%s2830_s12 + $0x758] sm:$0xff] }
  0xc8   : > { %2265 = vmatprep.subr.bf16.mxu0 %v2264_v46  ;;  %v725_v46 = vld [vmem:[#allocation2 + $0x58] sm:$0x3]  ;;  %904 = vmatprep.mubr.f32.mxu0 %v750_v36  ;;  %v2282_v24 = vpack.c.bf16 %v1949_v11, %v1947_v62  ;;  %v2288_v48 = vpack.c.bf16 %v1958_v35, %v1956_v34  ;;  %v1961_v62 = vld [vmem:[%s2830_s12 + $0x770] sm:$0xff]  ;;  %v418_v35 = vld [vmem:[%s2830_s12 + $0x1c0] sm:$0xff] }
  0xc9   : > { %v753_v55 = vrot.slane %v725_v46, 2  ;;  %v464_v36 = vsel %vm446_vm3, %v458_v53, %v463_v20  ;;  %v355_v46 = vld [vmem:[#allocation2 + $0x8] sm:$0xff]  ;;  %v1965_v11 = vld [vmem:[%s2830_s12 + $0x790] sm:$0xff] }
  0xca   : > { %2139 = vmatpush1.bf16.msra.mxu1 %v2138_v54  ;;  %v747_v54 = vsel %vm734_vm2, %v745_v37, %v746_v28  ;;  %v1951_v28 = vld [vmem:[%s2830_s12 + $0x720] sm:$0xff]  ;;  %v2158_v37 = vpack.c.bf16 %v400_v27, %v398_v26  ;;  %v2298_v20 = vpack.c.bf16 %v1965_v11, %v1963_v9  ;;  %v421_v26 = vld [vmem:[%s2830_s12 + $0x1d8] sm:$0xff] }
  0xcb   : > { %2267 = vmatpush1.bf16.msra.mxu0 %v2266_v59  ;;  %2141 = vmatprep.subr.bf16.mxu1 %v2140_v60  ;;  %v431_v59 = vld [vmem:[#allocation2 + $0x38] sm:$0xfe]  ;;  %v430_v60 = vld [vmem:[#allocation2 + $0x30] sm:$0xfe]  ;;  %v754_v3 = vsel %vm734_vm2, %v749_v22, %v753_v55  ;;  %v354_v11 = vld [vmem:[#allocation2] sm:$0xff] }
  0xcc   : > { %2269 = vmatprep.subr.bf16.mxu0 %v2268_v2  ;;  %v460_v63 = vrot.slane %v431_v59, 1  ;;  %v457_v0 = vrot.slane %v430_v60, 1  ;;  %905 = vmatmul.mubr.f32.gmra.mrb[4].mxu0 %v747_v54  ;;  %v465_v2 = vrot.slane %v433_v45, 1  ;;  %v1955_v45 = vld [vmem:[%s2830_s12 + $0x740] sm:$0xff]  ;;  %v1962_v54 = vld [vmem:[%s2830_s12 + $0x778] sm:$0xff]  ;;  %v408_v59 = vld [vmem:[%s2830_s12 + $0x170] sm:$0xff] }
  0xcd   : > { %910 = vmatprep.mubr.f32.mxu0 %v754_v3  ;;  %v1959_v60 = vld [vmem:[%s2830_s12 + $0x760] sm:$0xff]  ;;  %v1966_v3 = vld [vmem:[%s2830_s12 + $0x798] sm:$0xff]  ;;  %v2166_v4 = vpack.c.bf16 %v408_v59, %v406_v58  ;;  %v1977_v58 = vld [vmem:[%s2830_s12 + $0x7f0] sm:$0xff] }
  0xce   : > { %2143 = vmatpush1.bf16.msra.mxu1 %v2142_v13  ;;  %v401_v13 = vld [vmem:[%s2830_s12 + $0x138] sm:$0xff]  ;;  %v462_v14 = vsel %vm446_vm3, %v460_v63, %v461_v52  ;;  %v459_v19 = vsel %vm446_vm3, %v457_v0, %v458_v53  ;;  %v466_v22 = vsel %vm446_vm3, %v461_v52, %v465_v2  ;;  %v1960_v53 = vld [vmem:[%s2830_s12 + $0x768] sm:$0xff]  ;;  %v925_v59 = vld [vmem:[#allocation2] sm:$0xf8] }
  0xcf   : > { %2271 = vmatpush1.bf16.msra.mxu0 %v2270_v42  ;;  %2145 = vmatprep.subr.bf16.mxu1 %v2144_v18  ;;  %v1952_v42 = vld [vmem:[%s2830_s12 + $0x728] sm:$0xff]  ;;  %v1954_v18 = vld [vmem:[%s2830_s12 + $0x738] sm:$0xff]  ;;  %v2156_v25 = vpack.c.bf16 %v401_v13, %v399_v12  ;;  %v2292_v61 = vpack.c.bf16 %v1962_v54, %v1960_v53  ;;  %v422_v53 = vld [vmem:[%s2830_s12 + $0x1e0] sm:$0xff] }
  0xd0   : > { %2273 = vmatprep.subr.bf16.mxu0 %v2272_v23  ;;  %616 = vmatprep.mubr.f32.mxu1 %v462_v14  ;;  %v947_v23 = vsel %vm941_vm4, %v945_v1, %v946_v47  ;;  %v2284_v30 = vpack.c.bf16 %v1954_v18, %v1952_v42  ;;  %v409_v52 = vld [vmem:[%s2830_s12 + $0x178] sm:$0xff]  ;;  %v411_v63 = vld [vmem:[%s2830_s12 + $0x188] sm:$0xff]  ;;  %v2170_v42 = vpack.c.bf16 %v412_v8, %v410_v7  ;;  %v414_v18 = vld [vmem:[%s2830_s12 + $0x1a0] sm:$0xff] }
  0xd1   : > { %911 = vmatmul.mubr.f32.gmra.mrb[6].mxu0 %v752_v44  ;;  %617 = vmatmul.mubr.f32.gmra.mrb[4].mxu1 %v459_v19  ;;  %v2164_v57 = vpack.c.bf16 %v409_v52, %v407_v51  ;;  %v413_v0 = vld [vmem:[%s2830_s12 + $0x198] sm:$0xff]  ;;  %v1964_v2 = vld [vmem:[%s2830_s12 + $0x788] sm:$0xff]  ;;  %v424_v54 = vld [vmem:[%s2830_s12 + $0x1f0] sm:$0xff] }
  0xd2   : > { %2147 = vmatpush1.bf16.msra.mxu1 %v2146_v32  ;;  %v403_v32 = vld [vmem:[%s2830_s12 + $0x148] sm:$0xff]  ;;  %622 = vmatprep.mubr.f32.mxu1 %v466_v22  ;;  %v417_v13 = vld [vmem:[%s2830_s12 + $0x1b8] sm:$0xff]  ;;  %v1967_v22 = vld [vmem:[%s2830_s12 + $0x7a0] sm:$0xff] }
  0xd3   : > { %2275 = vmatpush1.bf16.msra.mxu0 %v2274_v38  ;;  %2149 = vmatprep.subr.bf16.mxu1 %v2148_v39  ;;  %v402_v38 = vld [vmem:[%s2830_s12 + $0x140] sm:$0xff]  ;;  %v2286_v39 = vpack.c.bf16 %v1953_v49, %v1951_v28  ;;  %v415_v12 = vld [vmem:[%s2830_s12 + $0x1a8] sm:$0xff]  ;;  %v1970_v1 = vld [vmem:[%s2830_s12 + $0x7b8] sm:$0xff] }
  0xd4   : > { %2277 = vmatprep.subr.bf16.mxu0 %v2276_v40  ;;  %1099 = vmatprep.mubr.f32.mxu0 %v947_v23  ;;  %v2160_v40 = vpack.c.bf16 %v405_v33, %v403_v32  ;;  %v2162_v55 = vpack.c.bf16 %v404_v43, %v402_v38  ;;  %v1968_v14 = vld [vmem:[%s2830_s12 + $0x7a8] sm:$0xff]  ;;  %v2172_v44 = vpack.c.bf16 %v417_v13, %v415_v12  ;;  %v1969_v23 = vld [vmem:[%s2830_s12 + $0x7b0] sm:$0xff]  ;;  %v425_v43 = vld [vmem:[%s2830_s12 + $0x1f8] sm:$0xff] }
  0xd5   : > { %623 = vmatmul.mubr.f32.gmra.mrb[6].mxu1 %v464_v36  ;;  %v335_v19 = vld [vmem:[#allocation2 + $0x20] ss:$8 sm:$0x3]  ;;  %v314_v27 = vld [vmem:[#allocation2 + $0x34] ss:$8 sm:$0x3]  ;;  %v2302_v33 = vpack.c.bf16 %v1969_v23, %v1967_v22 }
  0xd6   : > { %2151 = vmatpush1.bf16.msra.mxu1 %v2150_v56  ;;  %693 = vmatprep.mubr.f32.mxu1 %v355_v46  ;;  %v2290_v56 = vpack.c.bf16 %v1957_v50, %v1955_v45  ;;  %339 = vst.msk [vmem:[#allocation2 + $0x22] ss:$8 sm:$0x3] %vm2971_vm1, %v335_v19  ;;  %v1972_v28 = vld [vmem:[%s2830_s12 + $0x7c8] sm:$0xff]  ;;  %v420_v36 = vld [vmem:[%s2830_s12 + $0x1d0] sm:$0xff]  ;;  %v1978_v46 = vld [vmem:[%s2830_s12 + $0x7f8] sm:$0xff] }
  0xd7   : > { %2279 = vmatpush1.bf16.msra.mxu0 %v2278_v5  ;;  %2153 = vmatprep.subr.bf16.mxu1 %v2152_v6  ;;  %v2294_v5 = vpack.c.bf16 %v1961_v62, %v1959_v60  ;;  %v2168_v6 = vpack.c.bf16 %v413_v0, %v411_v63  ;;  %322 = vst.msk [vmem:[#allocation2 + $0x30] ss:$8 sm:$0x3] %vm2971_vm1, %v314_v27  ;;  %v337_v32 = vld [vmem:[#allocation2 + $0x50] ss:$8 sm:$0x3] }
  0xd8   : > { %2281 = vmatprep.subr.bf16.mxu0 %v2280_v10  ;;  %v2296_v10 = vpack.c.bf16 %v1966_v3, %v1964_v2  ;;  %342 = vst.msk [vmem:[#allocation2 + $0x52] ss:$8 sm:$0x3] %vm2971_vm1, %v337_v32  ;;  %v1976_v45 = vld [vmem:[%s2830_s12 + $0x7e8] sm:$0xff]  ;;  %v2178_v50 = vpack.c.bf16 %v420_v36, %v418_v35  ;;  %v2182_v63 = vpack.c.bf16 %v424_v54, %v422_v53  ;;  %v942_v2 = vrot.slane %v925_v59, 3  ;;  %v1986_v9 = vld [vmem:[%s2830_s12 + $0x838] sm:$0xff] }
  0xd9   : > { %v1980_v60 = vld [vmem:[%s2830_s12 + $0x808] sm:$0xff]  ;;  %v943_v3 = vrot.slane %v3022_v31, 3  ;;  %v1990_v23 = vld [vmem:[%s2830_s12 + $0x858] sm:$0xff]  ;;  %v1989_v32 = vld [vmem:[%s2830_s12 + $0x850] sm:$0xff] }
  0xda   : > { %2155 = vmatpush1.bf16.msra.mxu1 %v2154_v21  ;;  %v416_v21 = vld [vmem:[%s2830_s12 + $0x1b0] sm:$0xff]  ;;  %v1984_v8 = vld [vmem:[%s2830_s12 + $0x828] sm:$0xff]  ;;  %v1998_v54 = vld [vmem:[%s2830_s12 + $0x898] sm:$0xff] }
  0xdb   : > { %2283 = vmatpush1.bf16.msra.mxu0 %v2282_v24  ;;  %2157 = vmatprep.subr.bf16.mxu1 %v2156_v25  ;;  %v2300_v24 = vpack.c.bf16 %v1970_v1, %v1968_v14  ;;  %v419_v25 = vld [vmem:[%s2830_s12 + $0x1c8] sm:$0xff]  ;;  %v2174_v49 = vpack.c.bf16 %v416_v21, %v414_v18  ;;  %v944_v12 = vsel %vm941_vm4, %v942_v2, %v943_v3  ;;  %v1985_v18 = vld [vmem:[%s2830_s12 + $0x830] sm:$0xff]  ;;  %v1999_v2 = vld [vmem:[%s2830_s12 + $0x8a0] sm:$0xff] }
  0xdc   : > { %2285 = vmatprep.subr.bf16.mxu0 %v2284_v30  ;;  %v1974_v30 = vld [vmem:[%s2830_s12 + $0x7d8] sm:$0xff]  ;;  %v2176_v34 = vpack.c.bf16 %v421_v26, %v419_v25  ;;  %v2316_v1 = vpack.c.bf16 %v1986_v9, %v1984_v8  ;;  %v929_v21 = vld [vmem:[#allocation2 + $0x30] sm:$0xf8]  ;;  %v1988_v22 = vld [vmem:[%s2830_s12 + $0x848] sm:$0xff] }
  0xdd   : > { %v2304_v38 = vpack.c.bf16 %v1974_v30, %v1972_v28  ;;  %v928_v62 = vld [vmem:[#allocation2 + $0x28] sm:$0x7]  ;;  %v927_v7 = vld [vmem:[#allocation2 + $0x20] sm:$0x7]  ;;  %v952_v27 = vrot.slane %v929_v21, 3  ;;  %v953_v28 = vrot.slane %v3106_v17, 3  ;;  %v2320_v30 = vpack.c.bf16 %v1990_v23, %v1988_v22 }
  0xde   : > { %2159 = vmatpush1.bf16.msra.mxu1 %v2158_v37  ;;  %v1971_v37 = vld [vmem:[%s2830_s12 + $0x7c0] sm:$0xff]  ;;  %v948_v14 = vrot.slane %v927_v7, 3  ;;  %v359_v26 = vld [vmem:[#allocation2 + $0x38] sm:$0xff]  ;;  %v1992_v36 = vld [vmem:[%s2830_s12 + $0x868] sm:$0xff] }
  0xdf   : > { %2287 = vmatpush1.bf16.msra.mxu0 %v2286_v39  ;;  %2161 = vmatprep.subr.bf16.mxu1 %v2160_v40  ;;  %v1973_v39 = vld [vmem:[%s2830_s12 + $0x7d0] sm:$0xff]  ;;  %v423_v40 = vld [vmem:[%s2830_s12 + $0x1e8] sm:$0xff]  ;;  %v2003_v7 = vld [vmem:[%s2830_s12 + $0x8c0] sm:$0xff] }
  0xe0   : > { %2289 = vmatprep.subr.bf16.mxu0 %v2288_v48  ;;  %v345_v48 = vld [vmem:[#allocation2 + $0x17] ss:$8 sm:$0x3]  ;;  %v2306_v51 = vpack.c.bf16 %v1973_v39, %v1971_v37  ;;  %v2180_v52 = vpack.c.bf16 %v425_v43, %v423_v40  ;;  %v931_v35 = vld [vmem:[#allocation2 + $0x50] sm:$0x7]  ;;  %v954_v43 = vsel %vm941_vm4, %v952_v27, %v953_v28  ;;  %v1996_v53 = vld [vmem:[%s2830_s12 + $0x888] sm:$0xff] }
  0xe1   : > { %349 = vst.msk [vmem:[#allocation2 + $0x23] ss:$8 sm:$0x3] %vm2971_vm1, %v345_v48  ;;  %v1994_v37 = vld [vmem:[%s2830_s12 + $0x878] sm:$0xff]  ;;  %v358_v39 = vld [vmem:[#allocation2 + $0x30] sm:$0xff]  ;;  %v1991_v48 = vld [vmem:[%s2830_s12 + $0x860] sm:$0xff] }
  0xe2   : > { %2163 = vmatpush1.bf16.msra.mxu1 %v2162_v55  ;;  %v347_v55 = vld [vmem:[#allocation2 + $0x47] ss:$8 sm:$0x3]  ;;  %v1997_v59 = vld [vmem:[%s2830_s12 + $0x890] sm:$0xff]  ;;  %v2018_v22 = vld [vmem:[%s2830_s12 + $0x938] sm:$0xff] }
  0xe3   : > { %2291 = vmatpush1.bf16.msra.mxu0 %v2290_v56  ;;  %2165 = vmatprep.subr.bf16.mxu1 %v2164_v57  ;;  %v2308_v56 = vpack.c.bf16 %v1978_v46, %v1976_v45  ;;  %v1975_v57 = vld [vmem:[%s2830_s12 + $0x7e0] sm:$0xff]  ;;  %352 = vst.msk [vmem:[#allocation2 + $0x53] ss:$8 sm:$0x3] %vm2971_vm1, %v347_v55  ;;  %v958_v45 = vrot.slane %v931_v35, 3  ;;  %v2324_v46 = vpack.c.bf16 %v1994_v37, %v1992_v36  ;;  %v2005_v8 = vld [vmem:[%s2830_s12 + $0x8d0] sm:$0xff] }
  0xe4   : > { %2293 = vmatprep.subr.bf16.mxu0 %v2292_v61  ;;  %v1982_v61 = vld [vmem:[%s2830_s12 + $0x818] sm:$0xff]  ;;  %v2310_v0 = vpack.c.bf16 %v1977_v58, %v1975_v57  ;;  %v2328_v57 = vpack.c.bf16 %v1998_v54, %v1996_v53  ;;  %v1995_v58 = vld [vmem:[%s2830_s12 + $0x880] sm:$0xff]  ;;  %v2008_v9 = vld [vmem:[%s2830_s12 + $0x8e8] sm:$0xff] }
  0xe5   : > { %v2016_v21 = vld [vmem:[%s2830_s12 + $0x928] sm:$0xff]  ;;  %v2022_v27 = vld [vmem:[%s2830_s12 + $0x958] sm:$0xff]  ;;  %v2023_v37 = vld [vmem:[%s2830_s12 + $0x960] sm:$0xff] }
  0xe6   : > { %2167 = vmatpush1.bf16.msra.mxu1 %v2166_v4  ;;  %v2312_v4 = vpack.c.bf16 %v1982_v61, %v1980_v60  ;;  %v2000_v61 = vld [vmem:[%s2830_s12 + $0x8a8] sm:$0xff]  ;;  %v2031_v54 = vld [vmem:[%s2830_s12 + $0x9a0] sm:$0xff] }
  0xe7   : > { %2295 = vmatpush1.bf16.msra.mxu0 %v2294_v5  ;;  %2169 = vmatprep.subr.bf16.mxu1 %v2168_v6  ;;  %v1979_v5 = vld [vmem:[%s2830_s12 + $0x800] sm:$0xff]  ;;  %v950_v6 = vrot.slane %v928_v62, 3  ;;  %v2002_v62 = vld [vmem:[%s2830_s12 + $0x8b8] sm:$0xff] }
  0xe8   : > { %2297 = vmatprep.subr.bf16.mxu0 %v2296_v10  ;;  %v930_v10 = vld [vmem:[#allocation2 + $0x38] sm:$0xf8]  ;;  %v2314_v13 = vpack.c.bf16 %v1981_v29, %v1979_v5 }
  0xe9   : > { %v951_v19 = vsel %vm941_vm4, %v946_v47, %v950_v6  ;;  %v949_v47 = vsel %vm941_vm4, %v943_v3, %v948_v14  ;;  %v2001_v3 = vld [vmem:[%s2830_s12 + $0x8b0] sm:$0xff]  ;;  %v2006_v5 = vld [vmem:[%s2830_s12 + $0x8d8] sm:$0xff] }
  0xea   : > { %2171 = vmatpush1.bf16.msra.mxu1 %v2170_v42  ;;  %v1983_v42 = vld [vmem:[%s2830_s12 + $0x820] sm:$0xff]  ;;  %v2334_v29 = vpack.c.bf16 %v2001_v3, %v1999_v2  ;;  %v2009_v14 = vld [vmem:[%s2830_s12 + $0x8f0] sm:$0xff] }
  0xeb   : > { %2299 = vmatpush1.bf16.msra.mxu0 %v2298_v20  ;;  %2173 = vmatprep.subr.bf16.mxu1 %v2172_v44  ;;  %v955_v20 = vrot.slane %v930_v10, 3  ;;  %v956_v44 = vrot.slane %v3104_v16, 3  ;;  %v2318_v25 = vpack.c.bf16 %v1985_v18, %v1983_v42  ;;  %v2010_v10 = vld [vmem:[%s2830_s12 + $0x8f8] sm:$0xff]  ;;  %v2039_v3 = vld [vmem:[%s2830_s12 + $0x9e0] sm:$0xff] }
  0xec   : > { %2301 = vmatprep.subr.bf16.mxu0 %v2300_v24  ;;  %v932_v24 = vld [vmem:[#allocation2 + $0x58] sm:$0x7] }
  0xed   : > { %v2014_v42 = vld [vmem:[%s2830_s12 + $0x918] sm:$0xff] }
  0xee   : > { %2175 = vmatpush1.bf16.msra.mxu1 %v2174_v49  ;;  %v1987_v49 = vld [vmem:[%s2830_s12 + $0x840] sm:$0xff] }
  0xef   : > { %2303 = vmatpush1.bf16.msra.mxu0 %v2302_v33  ;;  %2177 = vmatprep.subr.bf16.mxu1 %v2176_v34  ;;  %v957_v33 = vsel %vm941_vm4, %v955_v20, %v956_v44  ;;  %v960_v34 = vrot.slane %v932_v24, 3  ;;  %v2322_v40 = vpack.c.bf16 %v1989_v32, %v1987_v49  ;;  %v2011_v20 = vld [vmem:[%s2830_s12 + $0x900] sm:$0xff]  ;;  %v2348_v24 = vpack.c.bf16 %v2018_v22, %v2016_v21  ;;  %v2021_v32 = vld [vmem:[%s2830_s12 + $0x950] sm:$0xff] }
  0xf0   : > { %2305 = vmatprep.subr.bf16.mxu0 %v2304_v38  ;;  %v1133_v38 = vld [vmem:[#allocation2 + $0x8] sm:$0xf0]  ;;  %v2019_v49 = vld [vmem:[%s2830_s12 + $0x940] sm:$0xff]  ;;  %v1160_v22 = vrot.slane %v3106_v17, 4 }
  0xf1   : > { %v2354_v35 = vpack.c.bf16 %v2021_v32, %v2019_v49 }
  0xf2   : > { %2179 = vmatpush1.bf16.msra.mxu1 %v2178_v50  ;;  %v1993_v50 = vld [vmem:[%s2830_s12 + $0x870] sm:$0xff] }
  0xf3   : > { %2307 = vmatpush1.bf16.msra.mxu0 %v2306_v51  ;;  %2181 = vmatprep.subr.bf16.mxu1 %v2180_v52  ;;  %v961_v51 = vsel %vm941_vm4, %v956_v44, %v960_v34  ;;  %v1153_v52 = vrot.slane %v2984_v41, 4  ;;  %v2326_v55 = vpack.c.bf16 %v1993_v50, %v1991_v48  ;;  %v2013_v44 = vld [vmem:[%s2830_s12 + $0x910] sm:$0xff]  ;;  %v2026_v34 = vld [vmem:[%s2830_s12 + $0x978] sm:$0xff]  ;;  %v2032_v50 = vld [vmem:[%s2830_s12 + $0x9a8] sm:$0xff] }
  0xf4   : > { %2309 = vmatprep.subr.bf16.mxu0 %v2308_v56  ;;  %v959_v56 = vsel %vm941_vm4, %v953_v28, %v958_v45  ;;  %v2346_v23 = vpack.c.bf16 %v2013_v44, %v2011_v20  ;;  %v2029_v48 = vld [vmem:[%s2830_s12 + $0x990] sm:$0xff]  ;;  %v1139_v20 = vld [vmem:[#allocation2 + $0x58] sm:$0xf] }
  0xf6   : > { %2183 = vmatpush1.bf16.msra.mxu1 %v2182_v63  ;;  %v2330_v63 = vpack.c.bf16 %v1997_v59, %v1995_v58 }
  0xf7   : > { %2311 = vmatpush1.bf16.msra.mxu0 %v2310_v0  ;;  %v2332_v0 = vpack.c.bf16 %v2002_v62, %v2000_v61  ;;  %v2037_v61 = vld [vmem:[%s2830_s12 + $0x9d0] sm:$0xff]  ;;  %v2040_v62 = vld [vmem:[%s2830_s12 + $0x9e8] sm:$0xff] }
  0xf8   : > { %2313 = vmatprep.subr.bf16.mxu0 %v2312_v4  ;;  %v2004_v4 = vld [vmem:[%s2830_s12 + $0x8c8] sm:$0xff] }
  0xf9   : > { %694 = vmatmul.mubr.f32.vlgmr.msra.gmra.mrb[0].mxu1 %v354_v11  ;;  %v2336_v6 = vpack.c.bf16 %v2006_v5, %v2004_v4  ;;  %v2338_v11 = vpack.c.bf16 %v2005_v8, %v2003_v7  ;;  %v2041_v4 = vld [vmem:[%s2830_s12 + $0x9f0] sm:$0xff]  ;;  %v1132_v5 = vld [vmem:[#allocation2] sm:$0xf0] }
  0xfa   : > { %1100 = vmatmul.mubr.f32.vlgmr.msra.gmra.mrb[0].mxu0 %v944_v12  ;;  %699 = vmatprep.mubr.f32.mxu1 %v2984_v41  ;;  %v2340_v12 = vpack.c.bf16 %v2010_v10, %v2008_v9  ;;  %v1149_v7 = vrot.slane %v1132_v5, 4  ;;  %v2479_v8 = vld [vmem:[#allocation2 + $0x10] sm:$0xff] }
  0xfb   : > { %2315 = vmatpush1.bf16.msra.mxu0 %v2314_v13  ;;  %1105 = vmatprep.mubr.f32.mxu0 %v951_v19  ;;  %v2007_v13 = vld [vmem:[%s2830_s12 + $0x8e0] sm:$0xff]  ;;  %v1150_v9 = vrot.slane %v2479_v8, 4 }
  0xfc   : > { %2317 = vmatprep.subr.bf16.mxu0 %v2316_v1  ;;  %v2012_v1 = vld [vmem:[%s2830_s12 + $0x908] sm:$0xff]  ;;  %v2342_v18 = vpack.c.bf16 %v2009_v14, %v2007_v13 }
  0xfd   : > { %700 = vmatmul.mubr.f32.gmra.mrb[2].mxu1 %v3022_v31  ;;  %v1152_v31 = vrot.slane %v1133_v38, 4  ;;  %v2344_v19 = vpack.c.bf16 %v2014_v42, %v2012_v1  ;;  %v2025_v38 = vld [vmem:[%s2830_s12 + $0x970] sm:$0xff]  ;;  %v1151_v13 = vsel %vm1148_vm5, %v1149_v7, %v1150_v9 }
  0xfe   : > { %1106 = vmatmul.mubr.f32.gmra.mrb[2].mxu0 %v949_v47  ;;  %705 = vmatprep.mubr.f32.mxu1 %v359_v26  ;;  %v2017_v47 = vld [vmem:[%s2830_s12 + $0x930] sm:$0xff]  ;;  %v2020_v26 = vld [vmem:[%s2830_s12 + $0x948] sm:$0xff] }
  0xff   : > { %2319 = vmatpush1.bf16.msra.mxu0 %v2318_v25  ;;  %1111 = vmatprep.mubr.f32.mxu0 %v957_v33  ;;  %v1154_v60 = vsel %vm1148_vm5, %v1152_v31, %v1153_v52  ;;  %v2015_v25 = vld [vmem:[%s2830_s12 + $0x920] sm:$0xff]  ;;  %v2024_v33 = vld [vmem:[%s2830_s12 + $0x968] sm:$0xff] }
 0x100   : > { %2321 = vmatprep.subr.bf16.mxu0 %v2320_v30  ;;  %v2350_v28 = vpack.c.bf16 %v2017_v47, %v2015_v25  ;;  %v2352_v30 = vpack.c.bf16 %v2022_v27, %v2020_v26  ;;  %v2356_v36 = vpack.c.bf16 %v2026_v34, %v2024_v33  ;;  %v1138_v25 = vld [vmem:[#allocation2 + $0x50] sm:$0xf]  ;;  %v1342_v27 = vld [vmem:[#allocation7 + $0x18] sm:$0xff] }
 0x101   : > { %706 = vmatmul.mubr.f32.gmra.mrb[4].mxu1 %v358_v39  ;;  %v2028_v39 = vld [vmem:[%s2830_s12 + $0x988] sm:$0xff] }
 0x102   : > { %1112 = vmatmul.mubr.f32.gmra.mrb[4].mxu0 %v954_v43  ;;  %711 = vmatprep.mubr.f32.mxu1 %v3104_v16  ;;  %v2358_v43 = vpack.c.bf16 %v2025_v38, %v2023_v37  ;;  %v1340_v26 = vld [vmem:[#allocation7 + $0x8] sm:$0xff] }
 0x103   : > { %2323 = vmatpush1.bf16.msra.mxu0 %v2322_v40  ;;  %1117 = vmatprep.mubr.f32.mxu0 %v961_v51  ;;  %v2030_v40 = vld [vmem:[%s2830_s12 + $0x998] sm:$0xff] }
 0x104   : > { %2325 = vmatprep.subr.bf16.mxu0 %v2324_v46  ;;  %v2360_v45 = vpack.c.bf16 %v2030_v40, %v2028_v39  ;;  %v2027_v46 = vld [vmem:[%s2830_s12 + $0x980] sm:$0xff]  ;;  %v2034_v51 = vld [vmem:[%s2830_s12 + $0x9b8] sm:$0xff] }
 0x105   : > { %712 = vmatmul.mubr.f32.gmra.mrb[6].mxu1 %v3106_v17  ;;  %v2362_v31 = vpack.c.bf16 %v2029_v48, %v2027_v46  ;;  %v2364_v53 = vpack.c.bf16 %v2034_v51, %v2032_v50  ;;  %v1339_v17 = vld [vmem:[#allocation7] sm:$0xff] }
 0x106   : > { %1118 = vmatmul.mubr.f32.gmra.mrb[6].mxu0 %v959_v56  ;;  %v2036_v56 = vld [vmem:[%s2830_s12 + $0x9c8] sm:$0xff] }
 0x107   : > { %2327 = vmatpush1.bf16.msra.mxu0 %v2326_v55  ;;  %1306 = vmatprep.mubr.f32.mxu0 %v1154_v60  ;;  %v2033_v55 = vld [vmem:[%s2830_s12 + $0x9b0] sm:$0xff]  ;;  %v2035_v60 = vld [vmem:[%s2830_s12 + $0x9c0] sm:$0xff] }
 0x108   : > { %2329 = vmatprep.subr.bf16.mxu0 %v2328_v57  ;;  %v2038_v57 = vld [vmem:[%s2830_s12 + $0x9d8] sm:$0xff]  ;;  %v2366_v58 = vpack.c.bf16 %v2033_v55, %v2031_v54 }
 0x109   : > { %v2368_v59 = vpack.c.bf16 %v2038_v57, %v2036_v56 }
 0x10b   : > { %2331 = vmatpush1.bf16.msra.mxu0 %v2330_v63  ;;  %v2042_v63 = vld [vmem:[%s2830_s12 + $0x9f8] sm:$0xff] }
 0x10c   : > { %2333 = vmatprep.subr.bf16.mxu0 %v2332_v0  ;;  %v2370_v0 = vpack.c.bf16 %v2037_v61, %v2035_v60  ;;  %v2372_v2 = vpack.c.bf16 %v2042_v63, %v2040_v62 }
 0x10f   : > { %2335 = vmatpush1.bf16.msra.mxu0 %v2334_v29  ;;  %v1135_v29 = vld [vmem:[#allocation2 + $0x28] sm:$0xf] }
 0x110   : > { %2337 = vmatprep.subr.bf16.mxu0 %v2336_v6  ;;  %v2374_v6 = vpack.c.bf16 %v2041_v4, %v2039_v3  ;;  %v1157_v10 = vrot.slane %v1135_v29, 4 }
 0x112   : > { %v1158_v1 = vsel %vm1148_vm5, %v1153_v52, %v1157_v10  ;;  %v1165_v52 = vrot.slane %v1138_v25, 4 }
 0x113   : > { %2339 = vmatpush1.bf16.msra.mxu0 %v2338_v11  ;;  %v1134_v11 = vld [vmem:[#allocation2 + $0x20] sm:$0xf] }
 0x114   : > { %2341 = vmatprep.subr.bf16.mxu0 %v2340_v12  ;;  %v1137_v12 = vld [vmem:[#allocation2 + $0x38] sm:$0xf0]  ;;  %v1155_v14 = vrot.slane %v1134_v11, 4  ;;  %v1166_v47 = vsel %vm1148_vm5, %v1160_v22, %v1165_v52 }
 0x115   : > { %v1162_v42 = vrot.slane %v1137_v12, 4 }
 0x116   : > { %v1156_v44 = vsel %vm1148_vm5, %v1150_v9, %v1155_v14 }
 0x117   : > { %2343 = vmatpush1.bf16.msra.mxu0 %v2342_v18  ;;  %v1163_v18 = vrot.slane %v3104_v16, 4 }
 0x118   : > { %2345 = vmatprep.subr.bf16.mxu0 %v2344_v19  ;;  %v1136_v19 = vld [vmem:[#allocation2 + $0x30] sm:$0xf0] }
 0x119   : > { %v1159_v21 = vrot.slane %v1136_v19, 4 }
 0x11b   : > { %2347 = vmatpush1.bf16.msra.mxu0 %v2346_v23  ;;  %v1164_v23 = vsel %vm1148_vm5, %v1162_v42, %v1163_v18  ;;  %v1161_v41 = vsel %vm1148_vm5, %v1159_v21, %v1160_v22 }
 0x11c   : > { %2349 = vmatprep.subr.bf16.mxu0 %v2348_v24  ;;  %v1167_v24 = vrot.slane %v1139_v20, 4 }
 0x11e   : > { %v1168_v16 = vsel %vm1148_vm5, %v1163_v18, %v1167_v24 }
 0x11f   : > { %2351 = vmatpush1.bf16.msra.mxu0 %v2350_v28  ;;  %v2376_v28 = vpack.c.bf16 %v1342_v27, %v1340_v26 }
 0x120   : > { %2353 = vmatprep.subr.bf16.mxu0 %v2352_v30  ;;  %v1341_v30 = vld [vmem:[#allocation7 + $0x10] sm:$0xff] }
 0x121   : > { %v3323_v49 = vpack.c.bf16 %v1341_v30, %v1339_v17  ;;  %2377 = vmatprep.subr.bf16.mxu1 %v2376_v28 }
 0x123   : > { %2355 = vmatpush1.bf16.msra.mxu0 %v2354_v35  ;;  %2379 = vmatpush1.bf16.xpose.msra.mxu1 %v3323_v49 }
 0x124   : > { %2357 = vmatprep.subr.bf16.mxu0 %v2356_v36  ;;  %2381 = vmatprep.subr.bf16.mxu1 %v2376_v28 }
 0x127   : > { %2359 = vmatpush1.bf16.msra.mxu0 %v2358_v43 }
 0x128   : > { %2361 = vmatprep.subr.bf16.mxu0 %v2360_v45 }
 0x12b   : > { %2363 = vmatpush1.bf16.msra.mxu0 %v2362_v31 }
 0x12c   : > { %2365 = vmatprep.subr.bf16.mxu0 %v2364_v53 }
 0x12f   : > { %2367 = vmatpush1.bf16.msra.mxu0 %v2366_v58 }
 0x130   : > { %2369 = vmatprep.subr.bf16.mxu0 %v2368_v59 }
 0x133   : > { %2371 = vmatpush1.bf16.msra.mxu0 %v2370_v0 }
 0x134   : > { %2373 = vmatprep.subr.bf16.mxu0 %v2372_v2 }
 0x137   : > { %2375 = vmatpush1.bf16.msra.mxu0 %v2374_v6 }
 0x13a   : > { %1307 = vmatmul.mubr.f32.vlgmr.msra.gmra.mrb[0].mxu0 %v1151_v13 }
 0x13b   : > { %1312 = vmatprep.mubr.f32.mxu0 %v1158_v1 }
 0x13e   : > { %1313 = vmatmul.mubr.f32.gmra.mrb[2].mxu0 %v1156_v44 }
 0x13f   : > { %1318 = vmatprep.mubr.f32.mxu0 %v1164_v23 }
 0x142   : > { %1319 = vmatmul.mubr.f32.gmra.mrb[4].mxu0 %v1161_v41 }
 0x143   : > { %1324 = vmatprep.mubr.f32.mxu0 %v1168_v16 }
 0x146   : > { %1325 = vmatmul.mubr.f32.gmra.mrb[6].mxu0 %v1166_v47 }
 0x1cc   : > { %v695_v32 = vpop.f32.mrb[0].mxu1 }
 0x1cd   : > { %v697_v33 = vpop.f32.mrb[1].mxu1 }
 0x1d0   : > { %v701_v34 = vpop.f32.mrb[2].mxu1 }
 0x1d1   : > { %v703_v35 = vpop.f32.mrb[3].mxu1 }
 0x1d4   : > { %v707_v36 = vpop.f32.mrb[4].mxu1 }
 0x1d5   : > { %v709_v37 = vpop.f32.mrb[5].mxu1 }
 0x1d8   : > { %v713_v38 = vpop.f32.mrb[6].mxu1 }
 0x1d9   : > { %v715_v39 = vpop.f32.mrb[7].mxu1 }
 0x20d   : > { %v1308_v40 = vpop.f32.mrb[0].mxu0 }
 0x20e   : > { %v3326_v43 = vadd.f32 %v1308_v40, %v695_v32  ;;  %v1310_v45 = vpop.f32.mrb[1].mxu0  ;;  %v2649_v40 = vmov 0.0  }
 0x20f   : > { %v3328_v46 = vadd.f32 %v1310_v45, %v697_v33 }
 0x210   : > { %v1361_v59 = vmul.f32 %v3326_v43, %v3326_v43 }
 0x211   : > { %v1314_v48 = vpop.f32.mrb[2].mxu0  ;;  %v1362_v62 = vmul.f32 %v3328_v46, %v3328_v46 }
 0x212   : > { %v3330_v50 = vadd.f32 %v1314_v48, %v701_v34  ;;  %v1316_v51 = vpop.f32.mrb[3].mxu0 }
 0x213   : > { %v3332_v31 = vadd.f32 %v1316_v51, %v703_v35 }
 0x214   : > { %v1363_v54 = vmul.f32 %v3330_v50, %v3330_v50  ;;  %v1343_v60 = vadd.f32 %v3330_v50, %v3326_v43 }
 0x215   : > { %v1320_v53 = vpop.f32.mrb[4].mxu0  ;;  %v1364_v57 = vmul.f32 %v3332_v31, %v3332_v31  ;;  %v1352_v63 = vadd.f32 %v3332_v31, %v3328_v46 }
 0x216   : > { %v3336_v55 = vadd.f32 %v1320_v53, %v707_v36  ;;  %v1322_v56 = vpop.f32.mrb[5].mxu0  ;;  %v1369_v3 = vadd.f32 %v1363_v54, %v1361_v59 }
 0x217   : > { %v3340_v58 = vadd.f32 %v1322_v56, %v709_v37  ;;  %v1378_v6 = vadd.f32 %v1364_v57, %v1362_v62 }
 0x218   : > { %v1365_v61 = vmul.f32 %v3336_v55, %v3336_v55  ;;  %v1344_v4 = vadd.f32 %v3336_v55, %v1343_v60 }
 0x219   : > { %v1366_v0 = vmul.f32 %v3340_v58, %v3340_v58  ;;  %v1326_v2 = vpop.f32.mrb[6].mxu0  ;;  %v1353_v7 = vadd.f32 %v3340_v58, %v1352_v63 }
 0x21a   : > { %v3355_v5 = vadd.f32 %v1326_v2, %v713_v38  ;;  %v1328_v29 = vpop.f32.mrb[7].mxu0  ;;  %v1370_v9 = vadd.f32 %v1369_v3, %v1365_v61  ;;  %v1467_v61 = vld [vmem:[%s2837_s22] sm:$0x1] }
 0x21b   : > { %v3358_v8 = vadd.f32 %v1328_v29, %v715_v39  ;;  %v1379_v12 = vadd.f32 %v1378_v6, %v1366_v0  ;;  %v1468_v0 = vld [vmem:[%s2837_s22 + $0x1] sm:$0x1]  ;;  %v1557_v29 = vshrl.u32 %v315_v15, 7 }
 0x21c   : > { %v1345_v10 = vadd.f32 %v3355_v5, %v1344_v4  ;;  %v1367_v11 = vmul.f32 %v3355_v5, %v3355_v5 }
 0x21d   : > { %v1354_v13 = vadd.f32 %v3358_v8, %v1353_v7  ;;  %v1368_v14 = vmul.f32 %v3358_v8, %v3358_v8  ;;  %v1558_v6 = vsub.s32 0, %v1557_v29  ;;  %v1574_v7 = vsub.s32 1, %v1557_v29 }
 0x21e   : > { %v1346_v1 = vrot.slane %v1345_v10, 4  ;;  %v1371_v42 = vadd.f32 %v1370_v9, %v1367_v11 }
 0x21f   : > { %v1355_v18 = vrot.slane %v1354_v13, 4  ;;  %v1380_v19 = vadd.f32 %v1379_v12, %v1368_v14 }
 0x220   : > { %v1347_v20 = vadd.f32 %v1346_v1, %v1345_v10  ;;  %v1372_v44 = vrot.slane %v1371_v42, 4 }
 0x221   : > { %v1356_v21 = vadd.f32 %v1355_v18, %v1354_v13  ;;  %v1381_v22 = vrot.slane %v1380_v19, 4 }
 0x222   : > { %v1348_v23 = vrot.slane %v1347_v20, 2  ;;  %v1373_v24 = vadd.f32 %v1372_v44, %v1371_v42 }
 0x223   : > { %v1357_v25 = vrot.slane %v1356_v21, 2  ;;  %v1382_v41 = vadd.f32 %v1381_v22, %v1380_v19 }
 0x224   : > { %v1349_v52 = vadd.f32 %v1348_v23, %v1347_v20  ;;  %v1374_v16 = vrot.slane %v1373_v24, 2 }
 0x225   : > { %v1358_v47 = vadd.f32 %v1357_v25, %v1356_v21  ;;  %v1383_v26 = vrot.slane %v1382_v41, 2 }
 0x226   : > { %v1375_v27 = vadd.f32 %v1374_v16, %v1373_v24  ;;  %v1350_v30 = vrot.slane %v1349_v52, 1 }
 0x227   : > { %v1359_v28 = vrot.slane %v1358_v47, 1  ;;  %v1384_v17 = vadd.f32 %v1383_v26, %v1382_v41 }
 0x228   : > { %v1376_v32 = vrot.slane %v1375_v27, 1  ;;  %v1351_v37 = vadd.f32 %v1350_v30, %v1349_v52 }
 0x229   : > { %v1385_v33 = vrot.slane %v1384_v17, 1  ;;  %v1360_v35 = vadd.f32 %v1359_v28, %v1358_v47 }
 0x22a   : > { %v1377_v34 = vadd.f32 %v1376_v32, %v1375_v27 }
 0x22b   : > { %v1386_v36 = vadd.f32 %v1385_v33, %v1384_v17 }
 0x22c   : > { %v1388_v39 = vsel %vm1387_vm6, %v1351_v37, %v1377_v34 }
 0x22d   : > { %v1389_v38 = vsel %vm1387_vm6, %v1360_v35, %v1386_v36 }
 0x22e   : > { %1454 = vmatprep.mubr.f32.mxu1 %v1389_v38 }
 0x22f   : > { %1455 = vmatmul.mubr.f32.vlgmr.msra.gmra.mrb[8].mxu1 %v1388_v39 }
 0x230   : > { %2383 = vmatpush1.bf16.msra.mxu1 %v3323_v49  ;;  %1549 = vmatprep.mubr.f32.mxu1 %v2649_v40 }
 0x302   : > { %v1456_v45 = vpop.f32.mrb[8].mxu1 }
 0x303   : > { %v1460_v48 = vmul.f32 0.001953125, %v1456_v45  ;;  %v1458_v51 = vpop.f32.mrb[9].mxu1 }
 0x305   : > { %v1461_v53 = vmul.f32 %v1460_v48, %v1460_v48 }
 0x307   : > { %v1463_v54 = vrot.slane %v1461_v53, 7 }
 0x309   : > { %v1465_v56 = vsub.f32 %v1460_v48, %v1463_v54 }
 0x30b   : > { %v1466_v57 = vmax.f32 %v1465_v56, 0.0 }
 0x30d   : > { %v1469_v59 = vadd.f32 1e-05, %v1466_v57 }
 0x30f   : > { %2477 = vrsqrt.f32 %v1469_v59 }
 0x319   : > { %v2478_v60 = vpop.eup %2477 }
 0x31a   : > { %v1472_v62 = vrot.slane %v2478_v60, 1 }
 0x31c   : > { %v1474_v63 = vmul.f32 %v1472_v62, %v1467_v61 }
 0x31e   : > { %v1475_v2 = vmul.f32 %v1474_v63, %v1460_v48 }
 0x320   : > { %v1476_v3 = vsub.f32 %v1468_v0, %v1475_v2 }
 0x322   : > { %v1478_v49 = vrot.slane %v1476_v3, 7 }
 0x324   : > { %v1480_v4 = vsel %vm1387_vm6, %v1474_v63, %v1478_v49 }
 0x325   : > { %2043 = vmatmul.mubr.msk.f32.vlgmr.msra.gmra.mrb[10].mxu1 %vm1481_vm7, %v1480_v4 }
 0x3f8   : > { %v1551_v9 = vpop.f32.mrb[10].mxu1  ;;  %1591 = sbr.rel (%p2044_p9) target bundleno = 1033 (0x409), region = 56 }
 0x3f9   : > { %v1559_v10 = vrot.slane %v1551_v9, %v1558_v6  ;;  %v1553_v11 = vpop.f32.mrb[11].mxu1  ;;  %v1575_v12 = vrot.slane %v1551_v9, %v1574_v7 }
 0x3fa   : > { %v1563_v13 = vrot.slane %v1553_v11, %v1558_v6  ;;  %v1579_v14 = vrot.slane %v1553_v11, %v1574_v7 }
 0x3fb   : > { %v1564_v1 = vmul.f32 %v3326_v43, %v1559_v10  ;;  %v1566_v42 = vmul.f32 %v3330_v50, %v1559_v10  ;;  %v1568_v18 = vmul.f32 %v3336_v55, %v1559_v10  ;;  %v1570_v19 = vmul.f32 %v3355_v5, %v1559_v10 }
 0x3fc   : > { %v1565_v20 = vmul.f32 %v3328_v46, %v1563_v13  ;;  %v1567_v15 = vmul.f32 %v3332_v31, %v1563_v13  ;;  %v1569_v44 = vmul.f32 %v3340_v58, %v1563_v13  ;;  %v1571_v21 = vmul.f32 %v3358_v8, %v1563_v13 }
 0x3fd   : > { %v1580_v22 = vadd.f32 %v1575_v12, %v1564_v1  ;;  %v1582_v23 = vadd.f32 %v1575_v12, %v1566_v42  ;;  %v1584_v24 = vadd.f32 %v1575_v12, %v1568_v18  ;;  %v1586_v25 = vadd.f32 %v1575_v12, %v1570_v19 }
 0x3fe   : > { %v1581_v41 = vadd.f32 %v1579_v14, %v1565_v20  ;;  %v1583_v43 = vadd.f32 %v1579_v14, %v1567_v15  ;;  %v1585_v52 = vadd.f32 %v1579_v14, %v1569_v44  ;;  %v1587_v50 = vadd.f32 %v1579_v14, %v1571_v21 }
 0x3ff   : > { %v1592_v55 = vmax.f32 %v1580_v22, 0.0  ;;  %v1594_v46 = vmax.f32 %v1582_v23, 0.0  ;;  %v1596_v16 = vmax.f32 %v1584_v24, 0.0  ;;  %v1598_v47 = vmax.f32 %v1586_v25, 0.0 }
 0x400   : > { %v1593_v5 = vmax.f32 %v1581_v41, 0.0  ;;  %v1595_v31 = vmax.f32 %v1583_v43, 0.0  ;;  %v1597_v58 = vmax.f32 %v1585_v52, 0.0  ;;  %v1599_v28 = vmax.f32 %v1587_v50, 0.0 }
 0x401   : > { %v1609_v8 = vrot.slane %v1592_v55, 6  ;;  %v1611_v27 = vrot.slane %v1594_v46, 6  ;;  %v1615_v30 = vrot.slane %v1596_v16, 6  ;;  %v1617_v33 = vrot.slane %v1598_v47, 6 }
 0x402   : > { %v1610_v26 = vrot.slane %v1593_v5, 6  ;;  %v1613_v17 = vrot.slane %v1595_v31, 6  ;;  %v1616_v32 = vrot.slane %v1597_v58, 6  ;;  %v1619_v35 = vrot.slane %v1599_v28, 6 }
 0x403   : > { %1633 = vst [vmem:[#allocation2] sm:$0xfc] %v1609_v8  ;;  %v1612_v34 = vsel %vm1608_vm8, %v1609_v8, %v1611_v27  ;;  %1637 = vst [vmem:[#allocation2 + $0x20] sm:$0x3] %v1611_v27  ;;  %v1618_v37 = vsel %vm1608_vm8, %v1615_v30, %v1617_v33 }
 0x404   : > { %1634 = vst [vmem:[#allocation2 + $0x8] sm:$0xfc] %v1610_v26  ;;  %1635 = vst [vmem:[#allocation2 + $0x10] sm:$0xff] %v1612_v34  ;;  %v1614_v36 = vsel %vm1608_vm8, %v1610_v26, %v1613_v17  ;;  %v1620_v38 = vsel %vm1608_vm8, %v1616_v32, %v1619_v35 }
 0x405   : > { %1638 = vst [vmem:[#allocation2 + $0x28] sm:$0x3] %v1613_v17  ;;  %1639 = vst [vmem:[#allocation2 + $0x30] sm:$0xfc] %v1615_v30 }
 0x406   : > { %1640 = vst [vmem:[#allocation2 + $0x38] sm:$0xfc] %v1616_v32  ;;  %1643 = vst [vmem:[#allocation2 + $0x50] sm:$0x3] %v1617_v33 }
 0x407   : > { %1636 = vst [vmem:[#allocation2 + $0x18] sm:$0xff] %v1614_v36  ;;  %1641 = vst [vmem:[#allocation2 + $0x40] sm:$0xff] %v1618_v37 }
 0x408   : > { %1644 = vst [vmem:[#allocation2 + $0x58] sm:$0x3] %v1619_v35  ;;  %1642 = vst [vmem:[#allocation2 + $0x48] sm:$0xff] %v1620_v38 }
 0x409 PF: > { %p2045_p8 = scmp.ne.s32.totalorder %s2694_s19, 9 }
 0x40a   : > { %v2046_v39 = vmul.f32 (!%p2045_p8), -1.442695, %v1580_v22  ;;  %v2047_v40 = vmul.f32 (!%p2045_p8), -1.442695, %v1581_v41  ;;  %v2048_v45 = vmul.f32 (!%p2045_p8), -1.442695, %v1582_v23 }
 0x40b   : > { %1648 = sbr.rel (%p2045_p8) target bundleno = 1068 (0x42c), region = 60  ;;  %v2049_v48 = vmul.f32 (!%p2045_p8), -1.442695, %v1583_v43  ;;  %v2050_v51 = vmul.f32 (!%p2045_p8), -1.442695, %v1584_v24 }
 0x40c   : > { %2480 = vpow2.f32 (!%p2045_p8), %v2046_v39  ;;  %v2051_v53 = vmul.f32 (!%p2045_p8), -1.442695, %v1585_v52  ;;  %v2052_v54 = vmul.f32 (!%p2045_p8), -1.442695, %v1586_v25  ;;  %v2053_v56 = vmul.f32 (!%p2045_p8), -1.442695, %v1587_v50 }
 0x40d   : > { %2482 = vpow2.f32 (!%p2045_p8), %v2047_v40 }
 0x40e   : > { %2484 = vpow2.f32 (!%p2045_p8), %v2048_v45 }
 0x40f   : > { %2486 = vpow2.f32 (!%p2045_p8), %v2049_v48 }
 0x410   : > { %2488 = vpow2.f32 (!%p2045_p8), %v2050_v51 }
 0x411   : > { %2490 = vpow2.f32 (!%p2045_p8), %v2051_v53 }
 0x412   : > { %2492 = vpow2.f32 %v2052_v54 }
 0x413   : > { %2494 = vpow2.f32 %v2053_v56 }
 0x416   : > { %v2481_v57 = vpop.eup %2480 }
 0x417   : > { %v2483_v59 = vpop.eup %2482  ;;  %v1673_v60 = vadd.f32 1.0, %v2481_v57 }
 0x418   : > { %v2485_v61 = vpop.eup %2484  ;;  %v1674_v62 = vadd.f32 1.0, %v2483_v59 }
 0x419   : > { %v2487_v63 = vpop.eup %2486  ;;  %2496 = vrcp.f32 %v1673_v60  ;;  %v1675_v0 = vadd.f32 1.0, %v2485_v61 }
 0x41a   : > { %v2489_v2 = vpop.eup %2488  ;;  %2498 = vrcp.f32 %v1674_v62  ;;  %v1676_v3 = vadd.f32 1.0, %v2487_v63 }
 0x41b   : > { %v2491_v49 = vpop.eup %2490  ;;  %2500 = vrcp.f32 %v1675_v0  ;;  %v1677_v4 = vadd.f32 1.0, %v2489_v2 }
 0x41c   : > { %v2493_v29 = vpop.eup %2492  ;;  %2502 = vrcp.f32 %v1676_v3  ;;  %v1678_v6 = vadd.f32 1.0, %v2491_v49 }
 0x41d   : > { %v2495_v7 = vpop.eup %2494  ;;  %2504 = vrcp.f32 %v1677_v4  ;;  %v1679_v9 = vadd.f32 1.0, %v2493_v29 }
 0x41e   : > { %2506 = vrcp.f32 %v1678_v6  ;;  %v1680_v10 = vadd.f32 1.0, %v2495_v7 }
 0x41f   : > { %2508 = vrcp.f32 %v1679_v9 }
 0x420   : > { %2510 = vrcp.f32 %v1680_v10 }
 0x423   : > { %v2497_v11 = vpop.eup %2496 }
 0x424   : > { %v2499_v12 = vpop.eup %2498  ;;  %1697 = vst [vmem:[%s3428_s4] sm:$0xff] %v2497_v11 }
 0x425   : > { %v2501_v13 = vpop.eup %2500  ;;  %1698 = vst [vmem:[%s3428_s4 + $0x8] sm:$0xff] %v2499_v12 }
 0x426   : > { %v2503_v14 = vpop.eup %2502  ;;  %1699 = vst [vmem:[%s3428_s4 + $0x10] sm:$0xff] %v2501_v13 }
 0x427   : > { %v2505_v1 = vpop.eup %2504  ;;  %1700 = vst [vmem:[%s3428_s4 + $0x18] sm:$0xff] %v2503_v14 }
 0x428   : > { %v2507_v42 = vpop.eup %2506  ;;  %1701 = vst [vmem:[%s3428_s4 + $0x20] sm:$0xff] %v2505_v1 }
 0x429   : > { %v2509_v18 = vpop.eup %2508  ;;  %1702 = vst [vmem:[%s3428_s4 + $0x28] sm:$0xff] %v2507_v42 }
 0x42a   : > { %v2511_v19 = vpop.eup %2510  ;;  %1703 = vst [vmem:[%s3428_s4 + $0x30] sm:$0xff] %v2509_v18 }
 0x42b   : > { %1704 = vst [vmem:[%s3428_s4 + $0x38] sm:$0xff] %v2511_v19 }
 0x42c PF: > { %p17_p12 = scmp.ge.s32.totalorder %s2720_s25, 12   ;;  %s3443_s15 = smov %s2634_s16 }
 0x42d   : > { %s3444_s16 = smov %s2638_s17  ;;  %s3445_s17 = smov %s2749_s14 }
 0x42e   : > { %s3446_s18 = smov %s2720_s25  ;;  %19 = sbr.rel (!%p17_p12) target bundleno = 5 (0x5), region = 120 }
 0x435   :  { %1716 = vsyncpa [#allocation4], 1 }
 0x436   :  { %1718 = vsyncpa [#allocation4 + $0x1], 1 }
 0x437   :  { %1719 = vsyncpa [#allocation6], 1 }
 0x438   :  { %1721 = vsyncpa [#allocation6 + $0x1], 1 }

</bundles_post_ra>
